<compile_context>
chip_gen: v7x
topology: tpu7x:2x2x1
jax: 0.10.0
libtpu: 0.0.40
codegen_flags: <defaults>
</compile_context>

<pallas_src>
import functools
import math

import jax
import jax.numpy as jnp
from jax.experimental import pallas as pl
from jax.experimental.pallas import tpu as pltpu


def _round_up(x, m):
    return ((x + m - 1) // m) * m


# ----------------------------------------------------------------------------
# Kernel 1: embedding lookup as one-hot @ block-diagonal table (MXU matmul).
#   z_ref     : (TM, FOLD)         int32
#   table_ref : (FOLD*Vp, FOLD*H)  f32   block-diagonal copies of the table
#   out_ref   : (TM, FOLD*H)       f32   lane-dense (FOLD*H ~= 128)
# out[m, j*H + h] = table[z[m, j], h]
# ----------------------------------------------------------------------------
def _emb_kernel(z_ref, table_ref, out_ref, *, vp, fold):
    m = z_ref.shape[0]
    ids = jax.lax.broadcasted_iota(jnp.int32, (m, vp), 1)              # (TM, Vp)
    cols = [(z_ref[:, j:j + 1] == ids).astype(jnp.float32)
            for j in range(fold)]
    onehot = cols[0] if fold == 1 else jnp.concatenate(cols, axis=1)   # (TM, FOLD*Vp)
    out_ref[...] = jnp.dot(onehot, table_ref[...],
                           preferred_element_type=jnp.float32,
                           precision=jax.lax.Precision.HIGHEST)


def embed_z(z, table):
    """z: (B, N) int, table: (V, H) f32 (row 0 = padding) -> (B, N, H) f32."""
    B, N = z.shape
    V, H = table.shape
    M = B * N

    Vp = _round_up(V, 128)
    fold = max(1, 128 // H) if H < 128 else 1

    # Block-diagonal table: rows [j*Vp, j*Vp+V), cols [j*H, (j+1)*H) hold table.
    table_bd = jnp.zeros((fold * Vp, fold * H), jnp.float32)
    for j in range(fold):
        table_bd = table_bd.at[j * Vp:j * Vp + V, j * H:(j + 1) * H].set(
            table.astype(jnp.float32))

    M2 = -(-M // fold)                        # rows after packing `fold` atoms/row
    TM = min(512, _round_up(M2, 8))
    M2p = _round_up(M2, TM)
    # Padded entries use id 0 -> zeroed padding row -> sliced off below.
    z2 = jnp.zeros((M2p * fold,), jnp.int32).at[:M].set(
        z.reshape(M).astype(jnp.int32)).reshape(M2p, fold)

    out = pl.pallas_call(
        functools.partial(_emb_kernel, vp=Vp, fold=fold),
        out_shape=jax.ShapeDtypeStruct((M2p, fold * H), jnp.float32),
        grid_spec=pltpu.PrefetchScalarGridSpec(
            num_scalar_prefetch=0,
            grid=(M2p // TM,),
            in_specs=[pl.BlockSpec((TM, fold), lambda i: (i, 0)),
                      pl.BlockSpec((fold * Vp, fold * H), lambda i: (0, 0))],
            out_specs=pl.BlockSpec((TM, fold * H), lambda i: (i, 0)),
        ),
        compiler_params=pltpu.CompilerParams(
            dimension_semantics=("parallel",)),
    )(z2, table_bd)
    # (M2p, FOLD*H) -> (M2p*FOLD, H) is a contiguous row-major reshape.
    return out.reshape(M2p * fold, H)[:M].reshape(B, N, H)


# ----------------------------------------------------------------------------
# Kernel 2: pairwise distances + Gaussian RBF, lane-dense tiled output.
#   posq_ref    : (TQ, 3)       f32  query positions for this tile
#   poskt_ref   : (3, TK)       f32  key positions (transposed, un-repeated)
#   expand_ref  : (TK, TK*ef)   f32  0/1 expansion matrix (same every tile)
#   centers_ref : (1, TK*ef)    f32  RBF centers, tiled TK times (same every tile)
#   out_ref     : (TQ, TK*ef)        ef folded into the lane axis (ef-inner)
# ----------------------------------------------------------------------------
def _rbf_kernel(posq_ref, poskt_ref, expand_ref, centers_ref, out_ref, *, coeff):
    pq = posq_ref[...]                                   # (TQ, 3)
    pk = poskt_ref[...]                                  # (3, TK)
    # Per-coordinate differences and the sqrt: ONCE per (q, k) pair.
    dx = pq[:, 0:1] - pk[0:1, :]                         # (TQ, TK)
    dy = pq[:, 1:2] - pk[1:2, :]
    dz = pq[:, 2:3] - pk[2:3, :]
    dist = jnp.sqrt(dx * dx + dy * dy + dz * dz)         # (TQ, TK)  == el
    # Lane expansion dist[q, k] -> dist_rep[q, k*ef + e] on the idle MXU.
    # Exact for any pass scheme since the weights are exactly 0.0 / 1.0.
    dist_rep = jnp.dot(dist, expand_ref[...],
                       preferred_element_type=jnp.float32,
                       precision=jax.lax.Precision.HIGHEST)   # (TQ, TK*ef)
    # Only the irreducible delta / square / exp chain runs at full lane width.
    delta = dist_rep - centers_ref[...]
    out_ref[...] = jnp.exp(coeff * (delta * delta)).astype(out_ref.dtype)


def _choose_pair_tiles(n, ef_dim, itemsize=4, max_out_bytes=2 << 20, max_tk=512):
    """Pad-to-tile chooser.

    TQ is a multiple of 8, TK*ef a multiple of 128 (unmasked 128-lane stores),
    and the output tile is capped at ~max_out_bytes so the double-buffered
    output + Mosaic's full-width elementwise temporaries stay well inside
    v7x's 64 MiB VMEM (and trivially inside v5e/v6e's 128 MiB)."""
    lane_mult = 128 // math.gcd(ef_dim, 128)       # TK % lane_mult == 0 => TK*ef % 128 == 0
    nk_small = _round_up(n, lane_mult)
    tq = min(256, _round_up(n, 8))
    while True:
        if nk_small <= max_tk and tq * nk_small * ef_dim * itemsize <= max_out_bytes:
            tk = nk_small                           # single key tile covers all keys
        else:
            tk = (max_out_bytes // (tq * ef_dim * itemsize)) // 128 * 128
            tk = int(min(max(128, tk), max_tk))     # multiple of 128 when multi-tiled
        if tq * tk * ef_dim * itemsize <= max_out_bytes or tq <= 8:
            break
        tq = max(8, tq // 2)
    return tq, _round_up(n, tq), tk, _round_up(n, tk)


def pairwise_rbf(pos, ef_dim, step, coeff, out_dtype=jnp.float32):
    """pos: (B, N, 3) f32 -> ef (B, N, N, ef_dim)."""
    B, N, _ = pos.shape
    pos = pos.astype(jnp.float32)
    tq, nq_pad, tk, nk_pad = _choose_pair_tiles(N, ef_dim)
    nq_tiles, nk_tiles = nq_pad // tq, nk_pad // tk
    Lt = tk * ef_dim

    # Padded query positions and transposed (un-repeated) key positions.
    pos_q = jnp.zeros((B, nq_pad, 3), jnp.float32).at[:, :N, :].set(pos)
    pos_kt = jnp.zeros((B, 3, nk_pad), jnp.float32).at[:, :, :N].set(
        jnp.swapaxes(pos, 1, 2))

    # Per-tile constants (identical for every tile -> block index fixed at (0,0)).
    col = jnp.arange(Lt, dtype=jnp.int32)
    expand = (col[None, :] // ef_dim ==
              jnp.arange(tk, dtype=jnp.int32)[:, None]).astype(jnp.float32)   # (tk, Lt)
    centers = jnp.arange(ef_dim, dtype=jnp.float32) * jnp.float32(step)
    centers_rep = jnp.tile(centers, tk)[None, :]                              # (1, Lt)

    kernel = functools.partial(_rbf_kernel, coeff=float(coeff))
    out = pl.pallas_call(
        kernel,
        out_shape=jax.ShapeDtypeStruct((B, nq_pad, nk_pad * ef_dim), out_dtype),
        grid_spec=pltpu.PrefetchScalarGridSpec(
            num_scalar_prefetch=0,
            # (B, qi) fused into one big parallel axis -> even megacore split
            # even when B == 1; ki innermost so posq is reused across the sweep.
            grid=(B * nq_tiles, nk_tiles),
            in_specs=[
                pl.BlockSpec((None, tq, 3),
                             lambda m, ki: (m // nq_tiles, m % nq_tiles, 0)),
                pl.BlockSpec((None, 3, tk),
                             lambda m, ki: (m // nq_tiles, 0, ki)),
                pl.BlockSpec((tk, Lt), lambda m, ki: (0, 0)),
                pl.BlockSpec((1, Lt), lambda m, ki: (0, 0)),
            ],
            out_specs=pl.BlockSpec((None, tq, Lt),
                                   lambda m, ki: (m // nq_tiles, m % nq_tiles, ki)),
        ),
        compiler_params=pltpu.CompilerParams(
            dimension_semantics=("parallel", "arbitrary"),
            vmem_limit_bytes=48 * 1024 * 1024),
    )(pos_q, pos_kt, expand, centers_rep)

    # Strip padding (identity slice / reshape when N already tile-aligned).
    out = out[:, :N, :N * ef_dim]
    return out.reshape(B, N, N, ef_dim)


# ----------------------------------------------------------------------------
# Module wrapper
# ----------------------------------------------------------------------------
class Mol2GraphPallas:
    def __init__(self, z_hidden_dim, ef_dim, rbound_upper, max_z, key,
                 ef_dtype=jnp.float32):
        self.z_hidden_dim = z_hidden_dim
        self.ef_dim = ef_dim
        self.ef_dtype = ef_dtype    # bf16 here ~halves RBF writeback on v5e/v6e
        # Embedding table, deterministic init, row 0 zeroed (padding_idx=0).
        table = jax.random.normal(key, (max_z + 1, z_hidden_dim), jnp.float32)
        self.table = table.at[0].set(0.0)
        # Gaussian-smearing RBF parameters (stand-in, see TODO at top).
        if ef_dim > 1:
            self.step = float(rbound_upper) / float(ef_dim - 1)
        else:
            self.step = float(rbound_upper) if rbound_upper != 0.0 else 1.0
        self.coeff = -0.5 / (self.step * self.step)

    def __call__(self, z, pos):
        emb1 = embed_z(z, self.table)                                   # (B,N,H)
        ef = pairwise_rbf(pos, self.ef_dim, self.step, self.coeff,
                          out_dtype=self.ef_dtype)                      # (B,N,N,ef)
        return emb1, ef


def _reference(z, pos, table, ef_dim, step, coeff):
    emb1 = table[z]                                          # (B, N, H)
    ev = pos[:, :, None, :] - pos[:, None, :, :]             # (B, N, N, 3)
    el = jnp.sqrt(jnp.sum(ev * ev, axis=-1, keepdims=True))  # (B, N, N, 1)
    centers = jnp.arange(ef_dim, dtype=jnp.float32) * jnp.float32(step)
    ef = jnp.exp(coeff * (el - centers) ** 2)                # (B, N, N, ef)
    return emb1, ef


if __name__ == "__main__":
    B, N = 2, 8
    z_hidden_dim = 32
    ef_dim = 16
    max_z = 9
    rbound_upper = 5.0

    key = jax.random.PRNGKey(0)
    k_tab, k_z, k_pos = jax.random.split(key, 3)

    model = Mol2GraphPallas(z_hidden_dim, ef_dim, rbound_upper, max_z, k_tab)

    z = jax.random.randint(k_z, (B, N), 0, max_z + 1, dtype=jnp.int32)
    pos = 2.0 * jax.random.normal(k_pos, (B, N, 3), jnp.float32)

    emb1, ef = model(z, pos)
    emb1 = jax.block_until_ready(emb1)
    ef = jax.block_until_ready(ef)

    emb1_ref, ef_ref = _reference(z, pos, model.table, ef_dim,
                                  model.step, model.coeff)
    assert emb1.shape == (B, N, z_hidden_dim)
    assert ef.shape == (B, N, N, ef_dim)
    assert jnp.allclose(emb1, emb1_ref, atol=1e-5, rtol=1e-4)
    assert jnp.allclose(ef, ef_ref, atol=1e-5, rtol=1e-4)

    print("KERNEL_OK")
</pallas_src>

<mosaic_0001>
module attributes {stable_mosaic.version = 11 : i64} {
  func.func @_emb_kernel(%arg0: i32, %arg1: memref<8x4xi32, #tpu.memory_space<vmem>>, %arg2: memref<512x128xf32, #tpu.memory_space<vmem>>, %arg3: memref<8x128xf32, #tpu.memory_space<vmem>>) attributes {dimension_semantics = [#tpu.dimension_semantics<parallel>], iteration_bounds = array<i64: 1>, scalar_prefetch = 0 : i64, scratch_operands = 0 : i64, tpu.core_type = #tpu.core_type<tc>, window_params = [{transform_indices = @transform_0, window_bounds = array<i64: 8, 4>}, {pipeline_mode = #tpu.pipeline_mode<synchronous>, transform_indices = @transform_1, window_bounds = array<i64: 512, 128>}, {transform_indices = @transform_2, window_bounds = array<i64: 8, 128>}]} {
    %0 = tpu.iota {dimensions = array<i32: 1>} : vector<8x128xi32>
    %c0 = arith.constant 0 : index
    %c0_0 = arith.constant 0 : index
    %1 = vector.load %arg1[%c0, %c0_0] : memref<8x4xi32, #tpu.memory_space<vmem>>, vector<8x1xi32>
    %2 = vector.broadcast %1 : vector<8x1xi32> to vector<8x128xi32>
    %3 = arith.cmpi eq, %2, %0 : vector<8x128xi32>
    %4 = arith.extui %3 : vector<8x128xi1> to vector<8x128xi32>
    %5 = arith.sitofp %4 : vector<8x128xi32> to vector<8x128xf32>
    %c0_1 = arith.constant 0 : index
    %c1 = arith.constant 1 : index
    %6 = vector.load %arg1[%c0_1, %c1] : memref<8x4xi32, #tpu.memory_space<vmem>>, vector<8x1xi32>
    %7 = vector.broadcast %6 : vector<8x1xi32> to vector<8x128xi32>
    %8 = arith.cmpi eq, %7, %0 : vector<8x128xi32>
    %9 = arith.extui %8 : vector<8x128xi1> to vector<8x128xi32>
    %10 = arith.sitofp %9 : vector<8x128xi32> to vector<8x128xf32>
    %c0_2 = arith.constant 0 : index
    %c2 = arith.constant 2 : index
    %11 = vector.load %arg1[%c0_2, %c2] : memref<8x4xi32, #tpu.memory_space<vmem>>, vector<8x1xi32>
    %12 = vector.broadcast %11 : vector<8x1xi32> to vector<8x128xi32>
    %13 = arith.cmpi eq, %12, %0 : vector<8x128xi32>
    %14 = arith.extui %13 : vector<8x128xi1> to vector<8x128xi32>
    %15 = arith.sitofp %14 : vector<8x128xi32> to vector<8x128xf32>
    %c0_3 = arith.constant 0 : index
    %c3 = arith.constant 3 : index
    %16 = vector.load %arg1[%c0_3, %c3] : memref<8x4xi32, #tpu.memory_space<vmem>>, vector<8x1xi32>
    %17 = vector.broadcast %16 : vector<8x1xi32> to vector<8x128xi32>
    %18 = arith.cmpi eq, %17, %0 : vector<8x128xi32>
    %19 = arith.extui %18 : vector<8x128xi1> to vector<8x128xi32>
    %20 = arith.sitofp %19 : vector<8x128xi32> to vector<8x128xf32>
    %21 = tpu.concatenate %5, %10, %15, %20 in 1 : vector<8x128xf32>, vector<8x128xf32>, vector<8x128xf32>, vector<8x128xf32> -> vector<8x512xf32>
    %c0_4 = arith.constant 0 : index
    %c0_5 = arith.constant 0 : index
    %22 = vector.load %arg2[%c0_4, %c0_5] : memref<512x128xf32, #tpu.memory_space<vmem>>, vector<512x128xf32>
    %cst = arith.constant dense<0.000000e+00> : vector<8x128xf32>
    %23 = tpu.matmul %21, %22, %cst {dimension_numbers = #tpu.dot_dimension_numbers<[1], [0], [0], [1], [0, 0, 1, 1], [], []>, precision = #tpu.contract_precision<fp32>} : vector<8x512xf32>, vector<512x128xf32>, vector<8x128xf32> -> vector<8x128xf32>
    %c0_6 = arith.constant 0 : index
    %c0_7 = arith.constant 0 : index
    %24 = vector.load %arg3[%c0_6, %c0_7] : memref<8x128xf32, #tpu.memory_space<vmem>>, vector<8x128xf32>
    tpu.vector_store %arg3[%c0_6, %c0_7], %23 {strides = array<i32>} : memref<8x128xf32, #tpu.memory_space<vmem>>, vector<8x128xf32>,
    return
  }
  func.func @transform_0(%arg0: i32) -> (i32, i32) {
    %c0_i32 = arith.constant 0 : i32
    %c0_i32_0 = arith.constant 0 : i32
    return %arg0, %c0_i32 : i32, i32
  }
  func.func @transform_1(%arg0: i32) -> (i32, i32) {
    %c0_i32 = arith.constant 0 : i32
    %c0_i32_0 = arith.constant 0 : i32
    %c0_i32_1 = arith.constant 0 : i32
    return %c0_i32, %c0_i32_0 : i32, i32
  }
  func.func @transform_2(%arg0: i32) -> (i32, i32) {
    %c0_i32 = arith.constant 0 : i32
    %c0_i32_0 = arith.constant 0 : i32
    return %arg0, %c0_i32 : i32, i32
  }
}

</mosaic_0001>

<bundles_post_ra>
// kernel: tpu_custom_call.1
= control target key start
LH: loop header
LB: loop body
LE: loop exit
PB: predicated region body
PF: predicated region fallthrough
CT: control target
= control target key end

     0   :  { %7 = vsyncpa [#allocation3], 0  ;;  %s4187_s0 = inlined_call_operand.vmem [shape: s32[8,4], index: 0, kind: input, shape index: {}]   ;;  %s4188_s1 = inlined_call_operand.hbm [shape: f32[512,128], index: 1, kind: input, shape index: {}]   ;;  %s4189_s2 = inlined_call_operand.hbm [shape: f32[8,128], index: 2, kind: output, shape index: {}]  }
   0x1   :  { %8 = vsyncpa [#allocation4], 0  ;;  %s2740_s9 = smov [#allocation2]   ;;  %s2692_s13 = scalar_lea.hbm %s4188_s1, 8192 }
   0x2   :  { %s16_s10 = sshll.u32 %s2740_s9, 4  ;;  %p2693_p0 = scmp.ne.s32.totalorder %s4188_s1, %s2692_s13  ;;  %s17_s10 = int_to_ptr.vmem [resolvable:$true] %s16_s10 }
   0x3   :  { %p2696_p1 = scmp.lt.u32.totalorder %s2692_s13, %s4188_s1 }
   0x5   :  { %p2698_p2 = pnand %p2696_p1, %p2693_p0 }
   0x7   :  { %2701 = shalt.err (!%p2698_p2)
}
   0x8   :  { %s2702_s18 = scalar_lea.vmem %s17_s10, 8192  ;;  %p2707_p4 = scmp.lt.s32.totalorder %s17_s10, %s17_s10 }
   0x9   :  { %p2703_p3 = scmp.ne.s32.totalorder %s17_s10, %s2702_s18  ;;  %p2708_p5 = scmp.lt.s32.totalorder %s2702_s18, %s2702_s18 }
   0xb   :  { %p2709_p6 = por %p2708_p5, %p2707_p4 }
   0xd   :  { %p2710_p7 = pnand %p2709_p6, %p2703_p3 }
   0xf   :  { %2713 = shalt.err (!%p2710_p7)
}
  0x10   :  { %s2741_s19 = smov 128   ;;  %s2742_s20 = smov 8  }
  0x11   :  { %22 = dma.hbm_to_vmem [thread:$0]  %s4188_s1, 8192, %s17_s10, [#allocation3], %s2741_s19, %s2741_s19, %s2742_s20  }
  0x12   :  { %2736 = dma.done.wait [#allocation3], 8192  }
  0x13   :  { %2737 = vsyncadd [#allocation3], 4294959104  ;;  %v2743_v0 = vmov 1   ;;  %v2744_v1 = vmov 3   ;;  %v28_v2 = vld [vmem:[%s4187_s0] sm:$0xff]  ;;  %v2782_v4 = vld [vmem:[#allocation2 + $0x88] sm:$0xff] }
  0x14   :  { %2687 = vset.pattern.permute.xlu0 %v2743_v0  ;;  %2689 = vset.pattern.permute.xlu1 %v2744_v1  ;;  %v2780_v3 = vld [vmem:[#allocation2 + $0x80] sm:$0xff]  ;;  %v169_v6 = vand.u32 4294901760, %v2782_v4  ;;  %v2788_v8 = vld [vmem:[#allocation2 + $0x8] sm:$0xff]  ;;  %v2790_v9 = vld [vmem:[#allocation2 + $0x90] sm:$0xff]  ;;  %v2745_v24 = vmov 0   ;;  %v2746_v25 = vmov 2  }
  0x15   :  { %36 = vperm.xlu0 %2687, %v28_v2   ;;  %48 = vperm.xlu1 %2689, %v28_v2   ;;  %v166_v5 = vand.u32 4294901760, %v2780_v3  ;;  %v2786_v7 = vld [vmem:[#allocation2] sm:$0xff]  ;;  %v121_v11 = vand.u32 4294901760, %v2788_v8  ;;  %v2794_v12 = vld [vmem:[#allocation2 + $0x98] sm:$0xff]  ;;  %v172_v13 = vand.u32 4294901760, %v2790_v9  ;;  %v2797_v14 = vld [vmem:[#allocation2 + $0x10] sm:$0xff] }
  0x16   :  { %v118_v10 = vand.u32 4294901760, %v2786_v7  ;;  %v2799_v15 = vld [vmem:[#allocation2 + $0x18] sm:$0xff]  ;;  %v2805_v17 = vsub.f32 %v2782_v4, %v169_v6  ;;  %v175_v18 = vand.u32 4294901760, %v2794_v12  ;;  %v124_v19 = vand.u32 4294901760, %v2797_v14  ;;  %v2863_v42 = vld [vmem:[#allocation2 + $0xa0] sm:$0xff]  ;;  %v2871_v47 = vld [vmem:[#allocation2 + $0xa8] sm:$0xff] }
  0x17   :  { %v2802_v16 = vsub.f32 %v2780_v3, %v166_v5  ;;  %v2817_v21 = vsub.f32 %v2788_v8, %v121_v11  ;;  %v2822_v22 = vsub.f32 %v2790_v9, %v172_v13  ;;  %v127_v23 = vand.u32 4294901760, %v2799_v15  ;;  %v2876_v52 = vld [vmem:[#allocation2 + $0x20] sm:$0xff]  ;;  %v2878_v53 = vld [vmem:[#allocation2 + $0x28] sm:$0xff]  ;;  %v2881_v58 = vld [vmem:[#allocation2 + $0xb0] sm:$0xff]  ;;  %s2749_s0 = smov [#allocation5]  }
  0x18   :  { %v2812_v20 = vsub.f32 %v2786_v7, %v118_v10  ;;  %v4208_v27 = vand.u32 4294901760, %v2805_v17  ;;  %v2830_v28 = vsub.f32 %v2794_v12, %v175_v18  ;;  %v2835_v29 = vsub.f32 %v2797_v14, %v124_v19  ;;  %v2886_v63 = vld [vmem:[#allocation2 + $0xb8] sm:$0xff]  ;;  %v2895_v4 = vld [vmem:[#allocation2 + $0x30] sm:$0xff]  ;;  %s1848_s1 = sshll.u32 %s2749_s0, 4  ;;  %s1849_s1 = int_to_ptr.vmem [resolvable:$true] %s1848_s1 }
  0x19   :  { %2688 = vset.pattern.permute.xlu0 %v2745_v24  ;;  %2690 = vset.pattern.permute.xlu1 %v2746_v25  ;;  %v4210_v26 = vand.u32 4294901760, %v2802_v16  ;;  %v4204_v31 = vand.u32 4294901760, %v2817_v21  ;;  %v4203_v32 = vand.u32 4294901760, %v2822_v22  ;;  %v2843_v33 = vsub.f32 %v2799_v15, %v127_v23  ;;  %v2922_v8 = vld [vmem:[#allocation2 + $0x38] sm:$0xff]  ;;  %s2714_s25 = scalar_lea.vmem %s1849_s1, 128  ;;  %p2719_p9 = scmp.lt.s32.totalorder %s1849_s1, %s1849_s1 }
  0x1a   :  { %30 = vperm.xlu0 %2688, %v28_v2   ;;  %42 = vperm.xlu1 %2690, %v28_v2   ;;  %v4206_v30 = vand.u32 4294901760, %v2812_v20  ;;  %v352_v35 = vsub.f32 %v2805_v17, %v4208_v27  ;;  %v4202_v36 = vand.u32 4294901760, %v2830_v28  ;;  %v4199_v37 = vand.u32 4294901760, %v2835_v29  ;;  %p2715_p8 = scmp.ne.s32.totalorder %s1849_s1, %s2714_s25  ;;  %p2720_p10 = scmp.lt.s32.totalorder %s2714_s25, %s2714_s25 }
  0x1b   :  { %v345_v34 = vsub.f32 %v2802_v16, %v4210_v26  ;;  %v240_v39 = vsub.f32 %v2817_v21, %v4204_v31  ;;  %v359_v40 = vsub.f32 %v2822_v22, %v4203_v32  ;;  %v4195_v41 = vand.u32 4294901760, %v2843_v33  ;;  %v3085_v32 = vld [vmem:[#allocation2 + $0xe0] sm:$0xff] }
  0x1c   :  { %v233_v38 = vsub.f32 %v2812_v20, %v4206_v30  ;;  %v353_v44 = vand.u32 4294901760, %v352_v35  ;;  %v366_v45 = vsub.f32 %v2830_v28, %v4202_v36  ;;  %v247_v46 = vsub.f32 %v2835_v29, %v4199_v37  ;;  %v3111_v26 = vld [vmem:[#allocation2 + $0x60] sm:$0xff]  ;;  %p2721_p11 = por %p2720_p10, %p2719_p9 }
  0x1d   :  { %v346_v43 = vand.u32 4294901760, %v345_v34  ;;  %v241_v49 = vand.u32 4294901760, %v240_v39  ;;  %v360_v50 = vand.u32 4294901760, %v359_v40  ;;  %v254_v51 = vsub.f32 %v2843_v33, %v4195_v41 }
  0x1e   :  { %v234_v48 = vand.u32 4294901760, %v233_v38  ;;  %2691 = vset.pattern.permute.xlu0 %v2744_v1  ;;  %v367_v55 = vand.u32 4294901760, %v366_v45  ;;  %v248_v56 = vand.u32 4294901760, %v247_v46  ;;  %v178_v57 = vand.u32 4294901760, %v2863_v42  ;;  %p2722_p12 = pnand %p2721_p11, %p2715_p8 }
  0x1f   :  { %v2325_v54 = vpack.c.bf16 %v353_v44, %v346_v43  ;;  %v255_v60 = vand.u32 4294901760, %v254_v51  ;;  %v181_v61 = vand.u32 4294901760, %v2871_v47  ;;  %v2884_v62 = vpack.c.bf16 %v169_v6, %v166_v5 }
  0x20   :  { %v2327_v59 = vpack.c.bf16 %v241_v49, %v234_v48  ;;  %v2329_v0 = vpack.c.bf16 %v367_v55, %v360_v50  ;;  %v2891_v1 = vsub.f32 %v2863_v42, %v178_v57  ;;  %v130_v2 = vand.u32 4294901760, %v2876_v52 }
  0x21   :  { %2326 = vmatprep.subr.bf16.mxu1 %v2325_v54  ;;  %v133_v3 = vand.u32 4294901760, %v2878_v53  ;;  %v2331_v24 = vpack.c.bf16 %v255_v60, %v248_v56  ;;  %v2900_v5 = vsub.f32 %v2871_v47, %v181_v61  ;;  %2294 = vmatprep.subr.bf16.mxu0 %v2884_v62  ;;  %v2907_v6 = vpack.c.bf16 %v121_v11, %v118_v10  ;;  %v2975_v60 = vld [vmem:[#allocation2 + $0xc0] sm:$0xff] }
  0x22   :  { %2328 = vmatpush3.bf16.msra.mxu1 %v2327_v59  ;;  %v184_v25 = vand.u32 4294901760, %v2881_v58  ;;  %v4194_v34 = vand.u32 4294901760, %v2891_v1  ;;  %v2914_v35 = vsub.f32 %v2876_v52, %v130_v2  ;;  %v187_v7 = vand.u32 4294901760, %v2886_v63  ;;  %v3047_v52 = vld [vmem:[#allocation2 + $0x58] sm:$0xff] }
  0x23   :  { %2330 = vmatprep.subr.bf16.mxu1 %v2329_v0  ;;  %v2919_v38 = vsub.f32 %v2878_v53, %v133_v3  ;;  %v4193_v10 = vand.u32 4294901760, %v2900_v5  ;;  %2296 = vmatpush3.bf16.msra.mxu0 %v2907_v6  ;;  %v2935_v39 = vpack.c.bf16 %v175_v18, %v172_v13  ;;  %v136_v40 = vand.u32 4294901760, %v2895_v4  ;;  %v2977_v0 = vld [vmem:[#allocation2 + $0xc8] sm:$0xff] }
  0x24   :  { %v2929_v11 = vsub.f32 %v2881_v58, %v184_v25  ;;  %v373_v43 = vsub.f32 %v2891_v1, %v4194_v34  ;;  %v4192_v44 = vand.u32 4294901760, %v2914_v35  ;;  %v2946_v46 = vsub.f32 %v2886_v63, %v187_v7 }
  0x25   :  { %v4191_v45 = vand.u32 4294901760, %v2919_v38  ;;  %v380_v9 = vsub.f32 %v2900_v5, %v4193_v10  ;;  %2298 = vmatprep.subr.bf16.mxu0 %v2935_v39  ;;  %v139_v13 = vand.u32 4294901760, %v2922_v8  ;;  %v2957_v18 = vsub.f32 %v2895_v4, %v136_v40 }
  0x26   :  { %2332 = vmatpush3.bf16.msra.mxu1 %v2331_v24  ;;  %v4190_v12 = vand.u32 4294901760, %v2929_v11  ;;  %v374_v48 = vand.u32 4294901760, %v373_v43  ;;  %v261_v49 = vsub.f32 %v2914_v35, %v4192_v44  ;;  %v4196_v51 = vand.u32 4294901760, %v2946_v46 }
  0x27   :  { %v268_v50 = vsub.f32 %v2919_v38, %v4191_v45  ;;  %v381_v54 = vand.u32 4294901760, %v380_v9  ;;  %v4198_v56 = vand.u32 4294901760, %v2957_v18  ;;  %v2973_v59 = vsub.f32 %v2922_v8, %v139_v13  ;;  %v2988_v45 = vld [vmem:[#allocation2 + $0x40] sm:$0xff] }
  0x28   :  { %v387_v55 = vsub.f32 %v2929_v11, %v4190_v12  ;;  %v262_v24 = vand.u32 4294901760, %v261_v49  ;;  %v394_v9 = vsub.f32 %v2946_v46, %v4196_v51  ;;  %v2986_v12 = vpack.c.bf16 %v127_v23, %v124_v19  ;;  %v2999_v19 = vld [vmem:[#allocation2 + $0xd0] sm:$0xff] }
  0x29   :  { %v269_v43 = vand.u32 4294901760, %v268_v50  ;;  %v2333_v44 = vpack.c.bf16 %v381_v54, %v374_v48  ;;  %v275_v34 = vsub.f32 %v2957_v18, %v4198_v56  ;;  %v4197_v49 = vand.u32 4294901760, %v2973_v59  ;;  %v2994_v50 = vld [vmem:[#allocation2 + $0x48] sm:$0xff] }
  0x2a   :  { %v388_v10 = vand.u32 4294901760, %v387_v55  ;;  %v395_v51 = vand.u32 4294901760, %v394_v9  ;;  %2300 = vmatpush3.bf16.msra.mxu0 %v2986_v12  ;;  %v190_v14 = vand.u32 4294901760, %v2975_v60  ;;  %v193_v15 = vand.u32 4294901760, %v2977_v0 }
  0x2b   :  { %v2335_v41 = vpack.c.bf16 %v269_v43, %v262_v24  ;;  %2334 = vmatprep.subr.bf16.mxu1 %v2333_v44  ;;  %v276_v23 = vand.u32 4294901760, %v275_v34  ;;  %v282_v48 = vsub.f32 %v2973_v59, %v4197_v49  ;;  %v3008_v54 = vpack.c.bf16 %v181_v61, %v178_v57  ;;  %v3011_v24 = vld [vmem:[#allocation2 + $0xd8] sm:$0xff]  ;;  %v3045_v49 = vld [vmem:[#allocation2 + $0x50] sm:$0xff] }
  0x2c   :  { %v142_v55 = vand.u32 4294901760, %v2988_v45  ;;  %v2337_v43 = vpack.c.bf16 %v395_v51, %v388_v10  ;;  %v3016_v34 = vsub.f32 %v2975_v60, %v190_v14  ;;  %v3021_v44 = vsub.f32 %v2977_v0, %v193_v15 }
  0x2d   :  { %2336 = vmatpush3.bf16.msra.mxu1 %v2335_v41  ;;  %v145_v42 = vand.u32 4294901760, %v2994_v50  ;;  %v283_v47 = vand.u32 4294901760, %v282_v48  ;;  %2302 = vmatprep.subr.bf16.mxu0 %v3008_v54  ;;  %v3034_v57 = vpack.c.bf16 %v133_v3, %v130_v2  ;;  %v4214_v61 = vand.u32 4294901760, %v2999_v19 }
  0x2e   :  { %v3028_v41 = vsub.f32 %v2988_v45, %v142_v55  ;;  %2338 = vmatprep.subr.bf16.mxu1 %v2337_v43  ;;  %v4201_v10 = vand.u32 4294901760, %v3016_v34  ;;  %v4200_v51 = vand.u32 4294901760, %v3021_v44  ;;  %v4213_v48 = vand.u32 4294901760, %v3011_v24 }
  0x2f   :  { %v3042_v9 = vsub.f32 %v2994_v50, %v145_v42  ;;  %v2339_v53 = vpack.c.bf16 %v283_v47, %v276_v23  ;;  %2304 = vmatpush3.bf16.msra.mxu0 %v3034_v57  ;;  %v3054_v3 = vsub.f32 %v2999_v19, %v4214_v61  ;;  %v3060_v43 = vpack.c.bf16 %v187_v7, %v184_v25  ;;  %v68_v50 = vld [vmem:[#allocation2 + $0x78] sm:$0xff] }
  0x30   :  { %v4205_v2 = vand.u32 4294901760, %v3028_v41  ;;  %v401_v56 = vsub.f32 %v3016_v34, %v4201_v10  ;;  %v408_v23 = vsub.f32 %v3021_v44, %v4200_v51  ;;  %v3072_v37 = vsub.f32 %v3011_v24, %v4213_v48 }
  0x31   :  { %v4207_v47 = vand.u32 4294901760, %v3042_v9  ;;  %2340 = vmatpush3.bf16.msra.mxu1 %v2339_v53  ;;  %v4209_v63 = vand.u32 4294901760, %v3054_v3  ;;  %2306 = vmatprep.subr.bf16.mxu0 %v3060_v43  ;;  %v4211_v25 = vand.u32 4294901760, %v3045_v49  ;;  %v4212_v7 = vand.u32 4294901760, %v3047_v52 }
  0x32   :  { %v289_v58 = vsub.f32 %v3028_v41, %v4205_v2  ;;  %v402_v51 = vand.u32 4294901760, %v401_v56  ;;  %v409_v10 = vand.u32 4294901760, %v408_v23  ;;  %v4217_v53 = vand.u32 4294901760, %v3072_v37  ;;  %v3100_v23 = vld [vmem:[#allocation2 + $0xe8] sm:$0xff] }
  0x33   :  { %v296_v36 = vsub.f32 %v3042_v9, %v4207_v47  ;;  %v415_v2 = vsub.f32 %v3054_v3, %v4209_v63  ;;  %v3093_v30 = vsub.f32 %v3045_v49, %v4211_v25  ;;  %v3098_v56 = vsub.f32 %v3047_v52, %v4212_v7 }
  0x34   :  { %v290_v31 = vand.u32 4294901760, %v289_v58  ;;  %v2341_v47 = vpack.c.bf16 %v409_v10, %v402_v51  ;;  %v422_v58 = vsub.f32 %v3072_v37, %v4217_v53  ;;  %v3109_v63 = vpack.c.bf16 %v139_v13, %v136_v40 }
  0x35   :  { %v297_v27 = vand.u32 4294901760, %v296_v36  ;;  %v416_v25 = vand.u32 4294901760, %v415_v2  ;;  %v4216_v7 = vand.u32 4294901760, %v3093_v30  ;;  %v4215_v48 = vand.u32 4294901760, %v3098_v56  ;;  %v66_v36 = vld [vmem:[#allocation2 + $0x68] sm:$0xff]  ;;  %v83_v2 = vld [vmem:[#allocation2 + $0xf0] sm:$0xff] }
  0x36   :  { %4296 = vst [vmem:[#allocation8_spill] sm:$0xff] %v3109_v63  ;;  %v202_v10 = vand.u32 4294901760, %v3085_v32  ;;  %2342 = vmatprep.subr.bf16.mxu1 %v2341_v47  ;;  %v423_v61 = vand.u32 4294901760, %v422_v58  ;;  %2308 = vmatpush3.bf16.msra.mxu0 %v3109_v63  ;;  %v205_v4 = vand.u32 4294901760, %v3100_v23  ;;  %v3122_v8 = vpack.c.bf16 %v193_v15, %v190_v14  ;;  %v84_v47 = vld [vmem:[#allocation2 + $0xf8] sm:$0xff] }
  0x37   :  { %v2343_v51 = vpack.c.bf16 %v297_v27, %v290_v31  ;;  %v303_v40 = vsub.f32 %v3093_v30, %v4216_v7  ;;  %v310_v13 = vsub.f32 %v3098_v56, %v4215_v48  ;;  %v154_v31 = vand.u32 4294901760, %v3111_v26 }
  0x38   :  { %4297 = vst [vmem:[#allocation9_spill] sm:$0xff] %v3122_v8  ;;  %v3131_v27 = vsub.f32 %v3085_v32, %v202_v10  ;;  %v2345_v60 = vpack.c.bf16 %v423_v61, %v416_v25  ;;  %v3135_v0 = vsub.f32 %v3100_v23, %v205_v4  ;;  %2310 = vmatprep.subr.bf16.mxu0 %v3122_v8  ;;  %v157_v14 = vand.u32 4294901760, %v66_v36 }
  0x39   :  { %2344 = vmatpush3.bf16.msra.mxu1 %v2343_v51  ;;  %v3142_v15 = vpack.c.bf16 %v145_v42, %v142_v55  ;;  %v304_v32 = vand.u32 4294901760, %v303_v40  ;;  %v311_v58 = vand.u32 4294901760, %v310_v13  ;;  %v3146_v7 = vsub.f32 %v3111_v26, %v154_v31  ;;  %v67_v51 = vld [vmem:[#allocation2 + $0x70] sm:$0xff] }
  0x3a   :  { %v4221_v48 = vand.u32 4294901760, %v3131_v27  ;;  %2346 = vmatprep.subr.bf16.mxu1 %v2345_v60  ;;  %v4220_v61 = vand.u32 4294901760, %v3135_v0  ;;  %v3149_v25 = vsub.f32 %v66_v36, %v157_v14  ;;  %v208_v23 = vand.u32 4294901760, %v83_v2 }
  0x3b   :  { %4298 = vst [vmem:[#allocation10_spill] sm:$0xff] %v3142_v15  ;;  %2312 = vmatpush3.bf16.msra.mxu0 %v3142_v15  ;;  %v211_v45 = vand.u32 4294901760, %v84_v47  ;;  %v2347_v55 = vpack.c.bf16 %v311_v58, %v304_v32  ;;  %v4222_v40 = vand.u32 4294901760, %v3146_v7  ;;  %v4299_v26 = vand.u32 4294901760, %v2999_v19 }
  0x3c   :  { %v429_v42 = vsub.f32 %v3131_v27, %v4221_v48  ;;  %v4300_v13 = vand.u32 4294901760, %v3011_v24  ;;  %v436_v36 = vsub.f32 %v3135_v0, %v4220_v61  ;;  %v4229_v53 = vand.u32 4294901760, %v3149_v25 }
  0x3d   :  { %v3166_v15 = vsub.f32 %v83_v2, %v208_v23  ;;  %v3168_v32 = vsub.f32 %v84_v47, %v211_v45  ;;  %2348 = vmatpush3.bf16.msra.mxu1 %v2347_v55  ;;  %v317_v19 = vsub.f32 %v3146_v7, %v4222_v40  ;;  %v160_v24 = vand.u32 4294901760, %v67_v51 }
  0x3e   :  { %v3160_v60 = vpack.c.bf16 %v4300_v13, %v4299_v26  ;;  %v430_v58 = vand.u32 4294901760, %v429_v42  ;;  %v163_v26 = vand.u32 4294901760, %v68_v50  ;;  %v437_v13 = vand.u32 4294901760, %v436_v36 }
  0x3f   :  { %v324_v61 = vsub.f32 %v3149_v25, %v4229_v53  ;;  %v4231_v2 = vand.u32 4294901760, %v3166_v15  ;;  %v4230_v47 = vand.u32 4294901760, %v3168_v32  ;;  %v318_v48 = vand.u32 4294901760, %v317_v19 }
  0x40   :  { %4301 = vst [vmem:[#allocation11_spill] sm:$0xff] %v3160_v60  ;;  %2314 = vmatprep.subr.bf16.mxu0 %v3160_v60  ;;  %v3179_v55 = vsub.f32 %v67_v51, %v160_v24  ;;  %v3181_v42 = vsub.f32 %v68_v50, %v163_v26  ;;  %v4302_v40 = vand.u32 4294901760, %v3045_v49  ;;  %v4303_v60 = vand.u32 4294901760, %v3047_v52 }
  0x41   :  { %v2349_v36 = vpack.c.bf16 %v437_v13, %v430_v58  ;;  %v325_v63 = vand.u32 4294901760, %v324_v61  ;;  %v443_v53 = vsub.f32 %v3166_v15, %v4231_v2  ;;  %v450_v19 = vsub.f32 %v3168_v32, %v4230_v47 }
  0x42   :  { %v3187_v8 = vpack.c.bf16 %v4303_v60, %v4302_v40  ;;  %v330_v51 = vand.u32 4294901760, %v3179_v55  ;;  %v337_v50 = vand.u32 4294901760, %v3181_v42  ;;  %v3198_v49 = vpack.c.bf16 %v205_v4, %v202_v10 }
  0x43   :  { %v3200_v52 = vpack.c.bf16 %v157_v14, %v154_v31  ;;  %2350 = vmatprep.subr.bf16.mxu1 %v2349_v36  ;;  %v2351_v61 = vpack.c.bf16 %v325_v63, %v318_v48  ;;  %v444_v40 = vand.u32 4294901760, %v443_v53  ;;  %v451_v60 = vand.u32 4294901760, %v450_v19 }
  0x44   :  { %2316 = vmatpush3.bf16.msra.mxu0 %v3187_v8  ;;  %v3202_v58 = vpack.c.bf16 %v211_v45, %v208_v23  ;;  %v331_v13 = vsub.f32 %v3179_v55, %v330_v51  ;;  %v338_v47 = vsub.f32 %v3181_v42, %v337_v50  ;;  %v3207_v2 = vpack.c.bf16 %v163_v26, %v160_v24 }
  0x45   :  { %2318 = vmatprep.subr.bf16.mxu0 %v3198_v49  ;;  %v2357_v10 = vpack.c.bf16 %v2805_v17, %v2802_v16  ;;  %2352 = vmatpush3.bf16.msra.mxu1 %v2351_v61  ;;  %v2353_v4 = vpack.c.bf16 %v451_v60, %v444_v40  ;;  %v4305_v61 = vand.u32 4294901760, %v2805_v17  ;;  %v4306_v60 = vand.u32 4294901760, %v2812_v20 }
  0x46   :  { %v332_v31 = vand.u32 4294901760, %v331_v13  ;;  %v339_v14 = vand.u32 4294901760, %v338_v47  ;;  %v4307_v19 = vand.u32 4294901760, %v2817_v21  ;;  %v4309_v47 = vand.u32 4294901760, %v2830_v28 }
  0x47   :  { %2354 = vmatprep.subr.bf16.mxu1 %v2353_v4  ;;  %v4308_v4 = vand.u32 4294901760, %v2822_v22  ;;  %v4311_v17 = vand.u32 4294901760, %v2843_v33  ;;  %v4317_v26 = vand.u32 4294901760, %v2946_v46 }
  0x48   :  { %2320 = vmatpush3.bf16.msra.mxu0 %v3200_v52  ;;  %v2355_v36 = vpack.c.bf16 %v339_v14, %v332_v31  ;;  %v4304_v14 = vand.u32 4294901760, %v2802_v16  ;;  %v3254_v13 = vpack.c.bf16 %v4307_v19, %v4306_v60  ;;  %v4310_v16 = vand.u32 4294901760, %v2835_v29 }
  0x49   :  { %2322 = vmatprep.subr.bf16.mxu0 %v3202_v58  ;;  %v3260_v31 = vpack.c.bf16 %v4309_v47, %v4308_v4  ;;  %v4313_v19 = vand.u32 4294901760, %v2900_v5  ;;  %v4315_v47 = vand.u32 4294901760, %v2919_v38 }
  0x4a   :  { %2356 = vmatpush3.bf16.msra.mxu1 %v2355_v36  ;;  %v3248_v40 = vpack.c.bf16 %v4305_v61, %v4304_v14  ;;  %v3267_v36 = vpack.c.bf16 %v4311_v17, %v4310_v16  ;;  %v4312_v61 = vand.u32 4294901760, %v2891_v1  ;;  %v4314_v14 = vand.u32 4294901760, %v2914_v35 }
  0x4b   :  { %2390 = vmatprep.subr.bf16.mxu1 %v2884_v62  ;;  %v4318_v16 = vand.u32 4294901760, %v2957_v18  ;;  %v4319_v17 = vand.u32 4294901760, %v2973_v59 }
  0x4c   :  { %2324 = vmatpush3.bf16.msra.mxu0 %v3207_v2  ;;  %v3273_v60 = vpack.c.bf16 %v4313_v19, %v4312_v61  ;;  %v3279_v4 = vpack.c.bf16 %v4315_v47, %v4314_v14  ;;  %v4321_v61 = vand.u32 4294901760, %v3016_v34  ;;  %v4322_v19 = vand.u32 4294901760, %v3021_v44 }
  0x4d   :  { %2358 = vmatprep.subr.bf16.mxu0 %v2357_v10  ;;  %v4316_v10 = vand.u32 4294901760, %v2929_v11  ;;  %v3291_v45 = vpack.c.bf16 %v4319_v17, %v4318_v16  ;;  %v4324_v14 = vand.u32 4294901760, %v3028_v41  ;;  %v4325_v47 = vand.u32 4294901760, %v3042_v9 }
  0x4e   :  { %v3297_v23 = vpack.c.bf16 %v4322_v19, %v4321_v61  ;;  %v4330_v16 = vand.u32 4294901760, %v3093_v30  ;;  %v4331_v17 = vand.u32 4294901760, %v3098_v56  ;;  %v4333_v61 = vand.u32 4294901760, %v3131_v27 }
  0x4f   :  { %v3285_v24 = vpack.c.bf16 %v4317_v26, %v4316_v10  ;;  %4320 = vst [vmem:[#allocation12_spill] sm:$0xff] %v3291_v45  ;;  %v3303_v53 = vpack.c.bf16 %v4325_v47, %v4324_v14  ;;  %v4327_v26 = vand.u32 4294901760, %v3054_v3  ;;  %v4328_v10 = vand.u32 4294901760, %v3072_v37 }
  0x50   :  { %4323 = vst [vmem:[#allocation13_spill] sm:$0xff] %v3297_v23  ;;  %v3315_v48 = vpack.c.bf16 %v4331_v17, %v4330_v16  ;;  %v4334_v19 = vand.u32 4294901760, %v3135_v0  ;;  %v4335_v14 = vand.u32 4294901760, %v3146_v7  ;;  %v4336_v47 = vand.u32 4294901760, %v3149_v25 }
  0x51   :  { %4326 = vst [vmem:[#allocation14_spill] sm:$0xff] %v3303_v53  ;;  %v3309_v63 = vpack.c.bf16 %v4328_v10, %v4327_v26  ;;  %v4337_v26 = vand.u32 4294901760, %v3166_v15  ;;  %v4338_v10 = vand.u32 4294901760, %v3168_v32  ;;  %v3335_v16 = vpack.c.bf16 %v337_v50, %v330_v51 }
  0x52   :  { %4332 = vst [vmem:[#allocation16_spill] sm:$0xff] %v3315_v48  ;;  %v3321_v23 = vpack.c.bf16 %v4334_v19, %v4333_v61  ;;  %v3327_v53 = vpack.c.bf16 %v4336_v47, %v4335_v14  ;;  %v26_v17 = vlaneseq  ;;  %v4232_v61 = vmov 0.0  }
  0x53   :  { %4329 = vst [vmem:[#allocation15_spill] sm:$0xff] %v3309_v63  ;;  %v3333_v63 = vpack.c.bf16 %v4338_v10, %v4337_v26  ;;  %4340 = vst [vmem:[#allocation18_spill] sm:$0xff] %v3335_v16  ;;  %v4240_v14 = vmov 1.0  }
  0x54   :  { %v3337_v48 = vand.u32 127, %v26_v17 }
  0x55   :  { %4339 = vst [vmem:[#allocation17_spill] sm:$0xff] %v3333_v63 }
  0x94   :  { %v3339_v45 = vpop.permute.xlu0 %36 }
  0x95   :  { %vm38_vm0 = vcmp.eq.s32.totalorder %v3339_v45, %v3337_v48 }
  0x96   :  { %v1858_v19 = vsel %vm38_vm0, 1.0, %v4232_v61  ;;  %1861 = vmatprep.mubr.msk.f32.mxu1 %vm38_vm0, %v4240_v14 }
  0x97   :  { %v214_v51 = vsub.f32 %v1858_v19, %v1858_v19 }
  0x99   :  { %v3351_v50 = vpop.permute.xlu0 %30  ;;  %v215_v47 = vand.u32 4294901760, %v214_v51 }
  0x9a   :  { %vm32_vm1 = vcmp.eq.s32.totalorder %v3351_v50, %v3337_v48 }
  0x9b   :  { %v1857_v26 = vsel %vm32_vm1, 1.0, %v4232_v61  ;;  %1862 = vmatmul.mubr.msk.f32.vlgmr.msra.gmra.mrb[0].mxu1 %vm32_vm1, %v4240_v14  ;;  %v216_v10 = vsub.f32 %v214_v51, %v215_v47 }
  0x9c   :  { %v3363_v17 = vsub.f32 %v1857_v26, %v1857_v26  ;;  %2392 = vmatpush3.bf16.msra.mxu1 %v2907_v6  ;;  %698 = vmatprep.mubr.f32.mxu1 %v215_v47  ;;  %v4341_v26 = vpack.c.bf16 %v2817_v21, %v2812_v20  ;;  %v4342_v47 = vpack.c.bf16 %v2830_v28, %v2822_v22  ;;  %v4347_v20 = vld [vmem:[#allocation10_spill] sm:$0xff]  ;;  %v4349_v22 = vld [vmem:[#allocation11_spill] sm:$0xff] }
  0x9d   :  { %2394 = vmatprep.subr.bf16.mxu1 %v2935_v39  ;;  %v217_v19 = vand.u32 4294901760, %v216_v10  ;;  %v4343_v10 = vld [vmem:[#allocation8_spill] sm:$0xff]  ;;  %v4348_v21 = vpack.c.bf16 %v2919_v38, %v2914_v35  ;;  %v4350_v28 = vpack.c.bf16 %v2946_v46, %v2929_v11  ;;  %v4355_v35 = vpack.c.bf16 %v2973_v59, %v2957_v18  ;;  %v3410_v46 = vld [vmem:[#allocation2 + $0x170] sm:$0xff] }
  0x9e   :  { %v221_v16 = vand.u32 4294901760, %v3363_v17  ;;  %4356 = vst [vmem:[#allocation19_spill] sm:$0xff] %v3410_v46  ;;  %v4237_v18 = vand.u32 4294901760, %v3410_v46 }
  0x9f   :  { %218 = vmatprep.mubr.f32.mxu0 %v217_v19  ;;  %v4344_v19 = vpack.c.bf16 %v2843_v33, %v2835_v29  ;;  %v3395_v29 = vld [vmem:[#allocation2 + $0x160] sm:$0xff]  ;;  %v3397_v33 = vld [vmem:[#allocation2 + $0x168] sm:$0xff] }
  0xa0   :  { %2396 = vmatpush3.bf16.msra.mxu1 %v2986_v12  ;;  %v222_v61 = vsub.f32 %v3363_v17, %v221_v16  ;;  %4351 = vst [vmem:[#allocation8_spill] sm:$0xff] %v3395_v29  ;;  %v4238_v38 = vand.u32 4294901760, %v3395_v29  ;;  %v4236_v11 = vand.u32 4294901760, %v3397_v33 }
  0xa1   :  { %2398 = vmatprep.subr.bf16.mxu1 %v3008_v54 }
  0xa2   :  { %v223_v63 = vand.u32 4294901760, %v222_v61  ;;  %v4345_v61 = vld [vmem:[#allocation9_spill] sm:$0xff] }
  0xa3   :  { %4352 = vst [vmem:[#allocation9_spill] sm:$0xff] %v3397_v33 }
  0xa4   :  { %2400 = vmatpush3.bf16.msra.mxu1 %v3034_v57  ;;  %224 = vmatmul.mubr.f32.vlgmr.msra.gmra.mrb[0].mxu0 %v223_v63  ;;  %v4346_v63 = vpack.c.bf16 %v2900_v5, %v2891_v1  ;;  %v3400_v1 = vld [vmem:[#allocation2 + $0x1f0] sm:$0xff]  ;;  %v3402_v5 = vld [vmem:[#allocation2 + $0x1f8] sm:$0xff] }
  0xa5   :  { %2360 = vmatpush3.bf16.msra.mxu0 %v4341_v26  ;;  %591 = vmatprep.mubr.f32.mxu0 %v214_v51  ;;  %4353 = vst [vmem:[#allocation10_spill] sm:$0xff] %v3400_v1  ;;  %4354 = vst [vmem:[#allocation11_spill] sm:$0xff] %v3402_v5  ;;  %v3412_v51 = vld [vmem:[#allocation2 + $0x178] sm:$0xff]  ;;  %v4358_v26 = vpack.c.bf16 %v3021_v44, %v3016_v34  ;;  %v3429_v34 = vsub.f32 %v3395_v29, %v4238_v38 }
  0xa6   :  { %2402 = vmatprep.subr.bf16.mxu1 %v3060_v43  ;;  %2362 = vmatprep.subr.bf16.mxu0 %v4342_v47  ;;  %4357 = vst [vmem:[#allocation20_spill] sm:$0xff] %v3412_v51  ;;  %v4235_v47 = vand.u32 4294901760, %v3400_v1  ;;  %v4239_v59 = vand.u32 4294901760, %v3412_v51  ;;  %v3434_v44 = vsub.f32 %v3397_v33, %v4236_v11  ;;  %v4362_v38 = vpack.c.bf16 %v3135_v0, %v3131_v27 }
  0xa7   :  { %v4363_v27 = vand.u32 4294901760, %v3429_v34 }
  0xa8   :  { %2404 = vmatpush3.bf16.msra.mxu1 %v4343_v10  ;;  %v4364_v0 = vand.u32 4294901760, %v3434_v44 }
  0xa9   :  { %2364 = vmatpush3.bf16.msra.mxu0 %v4344_v19  ;;  %2406 = vmatprep.subr.bf16.mxu1 %v4345_v61  ;;  %v4234_v19 = vand.u32 4294901760, %v3402_v5 }
  0xaa   :  { %2366 = vmatprep.subr.bf16.mxu0 %v4346_v63  ;;  %v4359_v63 = vpack.c.bf16 %v3042_v9, %v3028_v41  ;;  %v3441_v41 = vld [vmem:[#allocation2 + $0x188] sm:$0xff]  ;;  %v3443_v9 = vld [vmem:[#allocation2 + $0x100] sm:$0xff] }
  0xac   :  { %2408 = vmatpush3.bf16.msra.mxu1 %v4347_v20 }
  0xad   :  { %2368 = vmatpush3.bf16.msra.mxu0 %v4348_v21  ;;  %2410 = vmatprep.subr.bf16.mxu1 %v4349_v22  ;;  %v4360_v21 = vpack.c.bf16 %v3072_v37, %v3054_v3  ;;  %v3456_v37 = vld [vmem:[#allocation2 + $0x108] sm:$0xff]  ;;  %v3461_v3 = vsub.f32 %v3410_v46, %v4237_v18  ;;  %v4367_v18 = vpack.c.bf16 %v3149_v25, %v3146_v7 }
  0xae   :  { %2370 = vmatprep.subr.bf16.mxu0 %v4350_v28  ;;  %v3439_v28 = vld [vmem:[#allocation2 + $0x180] sm:$0xff]  ;;  %v3523_v7 = vld [vmem:[#allocation2 + $0x1a8] sm:$0xff] }
  0xaf   :  { %v4243_v14 = vand.u32 4294901760, %v3461_v3 }
  0xb0   :  { %2412 = vmatpush3.bf16.msra.mxu1 %v3187_v8 }
  0xb1   :  { %2372 = vmatpush3.bf16.msra.mxu0 %v4355_v35  ;;  %2414 = vmatprep.subr.bf16.mxu1 %v3198_v49  ;;  %v3448_v35 = vsub.f32 %v3400_v1, %v4235_v47  ;;  %v3474_v47 = vld [vmem:[#allocation2 + $0x198] sm:$0xff] }
  0xb2   :  { %2374 = vmatprep.subr.bf16.mxu0 %v4358_v26  ;;  %v3453_v26 = vsub.f32 %v3402_v5, %v4234_v19  ;;  %v3472_v19 = vld [vmem:[#allocation2 + $0x190] sm:$0xff] }
  0xb3   :  { %v4242_v11 = vand.u32 4294901760, %v3448_v35 }
  0xb4   :  { %2416 = vmatpush3.bf16.msra.mxu1 %v3200_v52 }
  0xb5   :  { %2376 = vmatpush3.bf16.msra.mxu0 %v4359_v63  ;;  %2418 = vmatprep.subr.bf16.mxu1 %v3202_v58  ;;  %v3466_v63 = vsub.f32 %v3412_v51, %v4239_v59  ;;  %v3521_v59 = vld [vmem:[#allocation2 + $0x1a0] sm:$0xff] }
  0xb6   :  { %2378 = vmatprep.subr.bf16.mxu0 %v4360_v21  ;;  %v4361_v21 = vpack.c.bf16 %v3098_v56, %v3093_v30  ;;  %v3484_v56 = vld [vmem:[#allocation2 + $0x110] sm:$0xff]  ;;  %v4366_v30 = vmov 1.0   ;;  %v4455_v50 = vand.u32 4294901760, %v3521_v59 }
  0xb8   :  { %2420 = vmatpush3.bf16.msra.mxu1 %v3207_v2 }
  0xb9   :  { %2380 = vmatpush3.bf16.msra.mxu0 %v4361_v21  ;;  %2454 = vmatprep.subr.bf16.mxu1 %v2884_v62  ;;  %v3487_v21 = vld [vmem:[#allocation2 + $0x118] sm:$0xff]  ;;  %v4370_v62 = vpack.c.bf16 %v3168_v32, %v3166_v15  ;;  %v4375_v15 = vand.u32 4294901760, %v3441_v41 }
  0xba   :  { %2382 = vmatprep.subr.bf16.mxu0 %v4362_v38  ;;  %v3495_v38 = vpack.c.bf16 %v4364_v0, %v4363_v27  ;;  %v4368_v27 = vand.u32 4294901760, %v3453_v26 }
  0xbb   :  { %702 = vmatmul.mubr.f32.vlgmr.msra.gmra.mrb[2].mxu1 %v221_v16  ;;  %v3539_v32 = vsub.f32 %v3441_v41, %v4375_v15  ;;  %v4383_v15 = vand.u32 4294901760, %v3474_v47 }
  0xbc   :  { %4365 = vst [vmem:[#allocation21_spill] sm:$0xff] %v3495_v38  ;;  %2456 = vmatpush3.bf16.msra.mxu1 %v2907_v6  ;;  %1865 = vmatprep.mubr.msk.f32.mxu1 %vm38_vm0, %v4366_v30  ;;  %v3515_v0 = vpack.c.bf16 %v4368_v27, %v4242_v11 }
  0xbd   :  { %2384 = vmatpush3.bf16.msra.mxu0 %v4367_v18  ;;  %2458 = vmatprep.subr.bf16.mxu1 %v2935_v39  ;;  %v4371_v39 = vand.u32 4294901760, %v3466_v63  ;;  %v4373_v18 = vand.u32 4294901760, %v3439_v28  ;;  %4376 = vst [vmem:[#allocation25_spill] sm:$0xff] %v3539_v32  ;;  %v3560_v6 = vsub.f32 %v3474_v47, %v4383_v15  ;;  %v4388_v15 = vand.u32 4294901760, %v3487_v21 }
  0xbe   :  { %4369 = vst [vmem:[#allocation22_spill] sm:$0xff] %v3515_v0  ;;  %2386 = vmatprep.subr.bf16.mxu0 %v4370_v62  ;;  %v4377_v62 = vand.u32 4294901760, %v3443_v9 }
  0xbf   :  { %v3529_v25 = vpack.c.bf16 %v4371_v39, %v4243_v14  ;;  %v3534_v27 = vsub.f32 %v3439_v28, %v4373_v18  ;;  %v4379_v39 = vand.u32 4294901760, %v3456_v37  ;;  %v4381_v18 = vand.u32 4294901760, %v3472_v19  ;;  %4384 = vst [vmem:[#allocation29_spill] sm:$0xff] %v3560_v6 }
  0xc0   :  { %v3544_v11 = vsub.f32 %v3443_v9, %v4377_v62  ;;  %2460 = vmatpush3.bf16.msra.mxu1 %v2986_v12  ;;  %v4385_v62 = vpack.c.bf16 %v3181_v42, %v3179_v55  ;;  %v4386_v12 = vand.u32 4294901760, %v3484_v56  ;;  %v3577_v0 = vsub.f32 %v3487_v21, %v4388_v15  ;;  %v3579_v55 = vld [vmem:[#allocation2 + $0x120] sm:$0xff] }
  0xc1   :  { %4372 = vst [vmem:[#allocation23_spill] sm:$0xff] %v3529_v25  ;;  %4374 = vst [vmem:[#allocation24_spill] sm:$0xff] %v3534_v27  ;;  %v3550_v14 = vsub.f32 %v3456_v37, %v4379_v39  ;;  %v3555_v16 = vsub.f32 %v3472_v19, %v4381_v18  ;;  %2462 = vmatprep.subr.bf16.mxu1 %v3008_v54  ;;  %v4244_v25 = vand.u32 4294901760, %v3521_v59  ;;  %v4245_v54 = vand.u32 4294901760, %v3534_v27  ;;  %v3605_v18 = vld [vmem:[#allocation2 + $0x128] sm:$0xff] }
  0xc2   :  { %4378 = vst [vmem:[#allocation26_spill] sm:$0xff] %v3544_v11  ;;  %2388 = vmatpush3.bf16.msra.mxu0 %v4385_v62  ;;  %v3569_v39 = vsub.f32 %v3484_v56, %v4386_v12  ;;  %4389 = vst [vmem:[#allocation31_spill] sm:$0xff] %v3577_v0  ;;  %v4246_v42 = vand.u32 4294901760, %v3539_v32  ;;  %v4247_v62 = vand.u32 4294901760, %v3544_v11  ;;  %v3620_v12 = vld [vmem:[#allocation2 + $0x1b0] sm:$0xff] }
  0xc3   :  { %4380 = vst [vmem:[#allocation27_spill] sm:$0xff] %v3550_v14  ;;  %4382 = vst [vmem:[#allocation28_spill] sm:$0xff] %v3555_v16  ;;  %2422 = vmatprep.subr.bf16.mxu0 %v3248_v40 }
  0xc4   :  { %4387 = vst [vmem:[#allocation30_spill] sm:$0xff] %v3569_v39  ;;  %2464 = vmatpush3.bf16.msra.mxu1 %v3034_v57  ;;  %v4391_v57 = vand.u32 4294901760, %v3523_v7  ;;  %v1214_v15 = vsub.f32 %v3539_v32, %v4246_v42  ;;  %v4395_v42 = vand.u32 4294901760, %v3560_v6 }
  0xc5   :  { %594 = vmatmul.mubr.f32.vlgmr.msra.gmra.mrb[2].mxu0 %v3363_v17  ;;  %v3598_v17 = vsub.f32 %v3521_v59, %v4244_v25  ;;  %2466 = vmatprep.subr.bf16.mxu1 %v3060_v43  ;;  %v1207_v25 = vsub.f32 %v3534_v27, %v4245_v54  ;;  %v4393_v43 = vand.u32 4294901760, %v3550_v14  ;;  %v4394_v54 = vand.u32 4294901760, %v3555_v16 }
  0xc6   :  { %2424 = vmatpush3.bf16.msra.mxu0 %v3254_v13  ;;  %1863 = vmatprep.mubr.msk.f32.mxu0 %vm38_vm0, %v4366_v30  ;;  %v3603_v40 = vsub.f32 %v3523_v7, %v4391_v57  ;;  %v1095_v57 = vsub.f32 %v3544_v11, %v4247_v62  ;;  %v3622_v13 = vld [vmem:[#allocation2 + $0x1b8] sm:$0xff]  ;;  %v1228_v38 = vsub.f32 %v3560_v6, %v4395_v42  ;;  %v4399_v42 = vand.u32 4294901760, %v3577_v0  ;;  %v3653_v6 = vld [vmem:[#allocation2 + $0x130] sm:$0xff] }
  0xc7   :  { %4390 = vst [vmem:[#allocation32_spill] sm:$0xff] %v3598_v17  ;;  %2426 = vmatprep.subr.bf16.mxu0 %v3260_v31  ;;  %v1102_v31 = vsub.f32 %v3550_v14, %v4393_v43  ;;  %v1221_v45 = vsub.f32 %v3555_v16, %v4394_v54  ;;  %v4397_v54 = vand.u32 4294901760, %v3579_v55  ;;  %v4268_v62 = vand.u32 4294901760, %v3622_v13 }
  0xc8   :  { %4392 = vst [vmem:[#allocation33_spill] sm:$0xff] %v3603_v40  ;;  %2468 = vmatpush3.bf16.msra.mxu1 %v4343_v10  ;;  %v4396_v10 = vand.u32 4294901760, %v3569_v39  ;;  %v1096_v43 = vand.u32 4294901760, %v1095_v57  ;;  %v1229_v32 = vand.u32 4294901760, %v1228_v38  ;;  %v4403_v38 = vand.u32 4294901760, %v3603_v40 }
  0xc9   :  { %2470 = vmatprep.subr.bf16.mxu1 %v4345_v61  ;;  %v3645_v16 = vsub.f32 %v3579_v55, %v4397_v54  ;;  %v1103_v14 = vand.u32 4294901760, %v1102_v31  ;;  %v1222_v54 = vand.u32 4294901760, %v1221_v45  ;;  %v3663_v61 = vld [vmem:[#allocation2 + $0x1c0] sm:$0xff]  ;;  %v3674_v31 = vpop.permute.xlu1 %48 }
  0xca   :  { %2428 = vmatpush3.bf16.msra.mxu0 %v3267_v36  ;;  %v1109_v11 = vsub.f32 %v3569_v39, %v4396_v10  ;;  %v1116_v36 = vsub.f32 %v3577_v0, %v4399_v42  ;;  %v1208_v10 = vand.u32 4294901760, %v1207_v25  ;;  %v1215_v39 = vand.u32 4294901760, %v1214_v15  ;;  %v3661_v42 = vld [vmem:[#allocation2 + $0x138] sm:$0xff]  ;;  %4404 = vst [vmem:[#allocation36_spill] sm:$0xff] %v3674_v31  ;;  %v3698_v0 = vld [vmem:[#allocation2 + $0x140] sm:$0xff] }
  0xcb   :  { %4398 = vst [vmem:[#allocation34_spill] sm:$0xff] %v3645_v16  ;;  %2430 = vmatprep.subr.bf16.mxu0 %v3273_v60  ;;  %v4400_v60 = vand.u32 4294901760, %v3605_v18  ;;  %v4402_v15 = vand.u32 4294901760, %v3598_v17  ;;  %v1242_v45 = vsub.f32 %v3603_v40, %v4403_v38  ;;  %v3688_v38 = vld [vmem:[#allocation2 + $0x1c8] sm:$0xff]  ;;  %vm50_vm2 = vcmp.eq.s32.totalorder %v3674_v31, %v3337_v48 }
  0xcc   :  { %2472 = vmatpush3.bf16.msra.mxu1 %v4347_v20  ;;  %v1110_v25 = vand.u32 4294901760, %v1109_v11  ;;  %v3685_v11 = vsub.f32 %v3622_v13, %v4268_v62  ;;  %v2517_v57 = vpack.c.bf16 %v1215_v39, %v1208_v10  ;;  %v4408_v62 = vld [vmem:[#allocation12_spill] sm:$0xff] }
  0xcd   :  { %v3659_v27 = vsub.f32 %v3605_v18, %v4400_v60  ;;  %2474 = vmatprep.subr.bf16.mxu1 %v4349_v22  ;;  %v1235_v20 = vsub.f32 %v3598_v17, %v4402_v15  ;;  %v1117_v60 = vand.u32 4294901760, %v1116_v36  ;;  %v4271_v15 = vand.u32 4294901760, %v3653_v6  ;;  %v4411_v17 = vld [vmem:[#allocation13_spill] sm:$0xff] }
  0xce   :  { %2432 = vmatpush3.bf16.msra.mxu0 %v3279_v4  ;;  %v4405_v4 = vand.u32 4294901760, %v3620_v12  ;;  %4407 = vst [vmem:[#allocation38_spill] sm:$0xff] %v3685_v11  ;;  %v3693_v36 = vpack.c.bf16 %v1103_v14, %v1096_v43  ;;  %v1243_v10 = vand.u32 4294901760, %v1242_v45  ;;  %v3712_v43 = vld [vmem:[#allocation2 + $0x1d0] sm:$0xff]  ;;  %v4414_v14 = vand.u32 4294901760, %v3441_v41 }
  0xcf   :  { %4401 = vst [vmem:[#allocation35_spill] sm:$0xff] %v3659_v27  ;;  %2434 = vmatprep.subr.bf16.mxu0 %v3285_v24  ;;  %v1236_v39 = vand.u32 4294901760, %v1235_v20  ;;  %v4409_v24 = vand.u32 4294901760, %v3645_v16  ;;  %4410 = vst [vmem:[#allocation12_spill] sm:$0xff] %v3712_v43  ;;  %v3724_v45 = vsub.f32 %v3653_v6, %v4271_v15  ;;  %v4419_v20 = vmov 0.0  }
  0xd0   :  { %v3680_v22 = vsub.f32 %v3620_v12, %v4405_v4  ;;  %2476 = vmatpush3.bf16.msra.mxu1 %v3187_v8  ;;  %v3695_v4 = vpack.c.bf16 %v1229_v32, %v1222_v54  ;;  %v3710_v32 = vld [vmem:[#allocation2 + $0x148] sm:$0xff]  ;;  %v3714_v54 = vld [vmem:[#allocation2 + $0x1d8] sm:$0xff]  ;;  %v1860_v15 = vsel %vm50_vm2, 1.0, %v4419_v20  ;;  %v4422_v41 = vand.u32 4294901760, %v3688_v38 }
  0xd1   :  { %2478 = vmatprep.subr.bf16.mxu1 %v3198_v49  ;;  %v3707_v8 = vsub.f32 %v3645_v16, %v4409_v24  ;;  %4412 = vst [vmem:[#allocation13_spill] sm:$0xff] %v3724_v45  ;;  %v4413_v24 = vand.u32 4294901760, %v3439_v28  ;;  %v4415_v16 = vand.u32 4294901760, %v3661_v42  ;;  %v3753_v49 = vld [vmem:[#allocation2 + $0x158] sm:$0xff]  ;;  %v2525_v51 = vpack.c.bf16 %v1243_v10, %v1236_v39 }
  0xd2   :  { %4406 = vst [vmem:[#allocation37_spill] sm:$0xff] %v3680_v22  ;;  %2436 = vmatpush3.bf16.msra.mxu0 %v4408_v62  ;;  %v3717_v62 = vpack.c.bf16 %v1117_v60, %v1110_v25  ;;  %v4417_v25 = vand.u32 4294901760, %v3663_v61  ;;  %v4425_v5 = vand.u32 4294901760, %v3680_v22  ;;  %v4430_v1 = vand.u32 4294901760, %v3714_v54 }
  0xd3   :  { %2438 = vmatprep.subr.bf16.mxu0 %v4411_v17  ;;  %v3730_v40 = vpack.c.bf16 %v4414_v14, %v4413_v24  ;;  %v3735_v17 = vsub.f32 %v3661_v42, %v4415_v16  ;;  %v3751_v24 = vld [vmem:[#allocation2 + $0x150] sm:$0xff]  ;;  %v1124_v46 = vand.u32 4294901760, %v3707_v8  ;;  %v3764_v14 = vsub.f32 %v3688_v38, %v4422_v41  ;;  %v4424_v16 = vld [vmem:[#allocation15_spill] sm:$0xff] }
  0xd4   :  { %v3740_v60 = vsub.f32 %v3663_v61, %v4417_v25  ;;  %2480 = vmatpush3.bf16.msra.mxu1 %v3200_v52  ;;  %v4420_v25 = vld [vmem:[#allocation14_spill] sm:$0xff]  ;;  %v4421_v52 = vand.u32 4294901760, %v3659_v27  ;;  %v3774_v8 = vsub.f32 %v1860_v15, %v1860_v15  ;;  %v4428_v15 = vand.u32 4294901760, %v3710_v32 }
  0xd5   :  { %4416 = vst [vmem:[#allocation39_spill] sm:$0xff] %v3735_v17  ;;  %2482 = vmatprep.subr.bf16.mxu1 %v3202_v58  ;;  %4423 = vst [vmem:[#allocation14_spill] sm:$0xff] %v3764_v14  ;;  %v4426_v58 = vand.u32 4294901760, %v3685_v11  ;;  %v4429_v41 = vand.u32 4294901760, %v3712_v43 }
  0xd6   :  { %4418 = vst [vmem:[#allocation40_spill] sm:$0xff] %v3740_v60  ;;  %2440 = vmatpush3.bf16.msra.mxu0 %v4420_v25  ;;  %v1130_v28 = vsub.f32 %v3659_v27, %v4421_v52  ;;  %v1249_v25 = vsub.f32 %v3680_v22, %v4425_v5  ;;  %v3776_v52 = vld [vmem:[#allocation2 + $0x1e0] sm:$0xff]  ;;  %v3778_v27 = vld [vmem:[#allocation2 + $0x1e8] sm:$0xff]  ;;  %v3803_v5 = vsub.f32 %v3714_v54, %v4430_v1  ;;  %v4287_v22 = vand.u32 4294901760, %v3764_v14 }
  0xd7   :  { %2442 = vmatprep.subr.bf16.mxu0 %v4424_v16  ;;  %v1256_v39 = vsub.f32 %v3685_v11, %v4426_v58  ;;  %v4427_v58 = vand.u32 4294901760, %v3698_v0  ;;  %v3793_v11 = vsub.f32 %v3710_v32, %v4428_v15  ;;  %v3798_v16 = vsub.f32 %v3712_v43, %v4429_v41 }
  0xd8   :  { %2484 = vmatpush3.bf16.msra.mxu1 %v3207_v2  ;;  %v4431_v2 = vld [vmem:[#allocation16_spill] sm:$0xff]  ;;  %v1250_v29 = vand.u32 4294901760, %v1249_v25  ;;  %v4432_v43 = vand.u32 4294901760, %v3724_v45  ;;  %v4435_v25 = vand.u32 4294901760, %v3751_v24 }
  0xd9   :  { %v3788_v10 = vsub.f32 %v3698_v0, %v4427_v58  ;;  %2518 = vmatprep.subr.bf16.mxu1 %v2517_v57  ;;  %v1131_v58 = vand.u32 4294901760, %v1130_v28  ;;  %v1257_v41 = vand.u32 4294901760, %v1256_v39  ;;  %v4433_v57 = vand.u32 4294901760, %v3735_v17 }
  0xda   :  { %2444 = vmatpush3.bf16.msra.mxu0 %v4431_v2  ;;  %v1137_v20 = vsub.f32 %v3724_v45, %v4432_v43  ;;  %v4434_v2 = vand.u32 4294901760, %v3740_v60  ;;  %v3827_v39 = vsub.f32 %v3751_v24, %v4435_v25  ;;  %v4436_v43 = vand.u32 4294901760, %v3753_v49 }
  0xdb   :  { %2446 = vmatprep.subr.bf16.mxu0 %v3321_v23  ;;  %1866 = vmatmul.mubr.msk.f32.vlgmr.msra.gmra.mrb[4].mxu1 %vm32_vm1, %v4366_v30  ;;  %v1144_v28 = vsub.f32 %v3735_v17, %v4433_v57  ;;  %v4437_v25 = vand.u32 4294901760, %v3776_v52  ;;  %v4439_v57 = vld [vmem:[#allocation17_spill] sm:$0xff]  ;;  %v2527_v15 = vpack.c.bf16 %v1131_v58, %v1124_v46  ;;  %v4443_v46 = vand.u32 4294901760, %v3788_v10 }
  0xdc   :  { %v1263_v23 = vsub.f32 %v3740_v60, %v4434_v2  ;;  %v3832_v1 = vsub.f32 %v3753_v49, %v4436_v43  ;;  %2520 = vmatpush3.bf16.msra.mxu1 %v3693_v36  ;;  %1867 = vmatprep.mubr.msk.f32.mxu1 %vm50_vm2, %v4366_v30  ;;  %v1270_v36 = vsub.f32 %v3764_v14, %v4287_v22  ;;  %v4438_v2 = vand.u32 4294901760, %v3778_v27 }
  0xdd   :  { %2522 = vmatprep.subr.bf16.mxu1 %v3695_v4  ;;  %v3851_v43 = vsub.f32 %v3776_v52, %v4437_v25  ;;  %v4441_v4 = vand.u32 4294901760, %v3456_v37  ;;  %v1138_v22 = vand.u32 4294901760, %v1137_v20  ;;  %v4442_v14 = vand.u32 4294901760, %v3774_v8 }
  0xde   :  { %2448 = vmatpush3.bf16.msra.mxu0 %v3327_v53  ;;  %v3856_v33 = vsub.f32 %v3778_v27, %v4438_v2  ;;  %v4440_v53 = vand.u32 4294901760, %v3443_v9  ;;  %v2529_v60 = vpack.c.bf16 %v1257_v41, %v1250_v29  ;;  %v1145_v17 = vand.u32 4294901760, %v1144_v28  ;;  %v4447_v28 = vld [vmem:[#allocation18_spill] sm:$0xff] }
  0xdf   :  { %2450 = vmatprep.subr.bf16.mxu0 %v4439_v57  ;;  %v1078_v25 = vsub.f32 %v3774_v8, %v4442_v14  ;;  %v1151_v9 = vsub.f32 %v3788_v10, %v4443_v46  ;;  %v4444_v37 = vand.u32 4294901760, %v3793_v11  ;;  %v4445_v58 = vand.u32 4294901760, %v3798_v16 }
  0xe0   :  { %v3863_v31 = vpack.c.bf16 %v4441_v4, %v4440_v53  ;;  %2524 = vmatpush3.bf16.msra.mxu1 %v3717_v62  ;;  %v4446_v29 = vand.u32 4294901760, %v3803_v5  ;;  %v1264_v62 = vand.u32 4294901760, %v1263_v23  ;;  %v1271_v57 = vand.u32 4294901760, %v1270_v36 }
  0xe1   :  { %v1158_v20 = vsub.f32 %v3793_v11, %v4444_v37  ;;  %v1277_v14 = vsub.f32 %v3798_v16, %v4445_v58  ;;  %2526 = vmatprep.subr.bf16.mxu1 %v2525_v51  ;;  %v1290_v53 = vand.u32 4294901760, %v3851_v43  ;;  %v4448_v46 = vand.u32 4294901760, %v3472_v19 }
  0xe2   :  { %v1284_v41 = vsub.f32 %v3803_v5, %v4446_v29  ;;  %2452 = vmatpush3.bf16.msra.mxu0 %v4447_v28  ;;  %v4449_v37 = vand.u32 4294901760, %v3474_v47  ;;  %v1079_v2 = vand.u32 4294901760, %v1078_v25  ;;  %v2531_v45 = vpack.c.bf16 %v1145_v17, %v1138_v22 }
  0xe3   :  { %2486 = vmatprep.subr.bf16.mxu0 %v3730_v40  ;;  %v4450_v29 = vand.u32 4294901760, %v3484_v56  ;;  %v4451_v51 = vand.u32 4294901760, %v3487_v21  ;;  %v4452_v36 = vand.u32 4294901760, %v3827_v39  ;;  %v4453_v4 = vand.u32 4294901760, %v3832_v1 }
  0xe4   :  { %v3891_v58 = vpack.c.bf16 %v4449_v37, %v4448_v46  ;;  %2528 = vmatpush3.bf16.msra.mxu1 %v2527_v15  ;;  %v1152_v47 = vand.u32 4294901760, %v1151_v9  ;;  %v1159_v56 = vand.u32 4294901760, %v1158_v20  ;;  %v1278_v22 = vand.u32 4294901760, %v1277_v14 }
  0xe5   :  { %v3897_v23 = vpack.c.bf16 %v4451_v51, %v4450_v29  ;;  %v1165_v28 = vsub.f32 %v3827_v39, %v4452_v36  ;;  %v1172_v19 = vsub.f32 %v3832_v1, %v4453_v4  ;;  %1864 = vmatmul.mubr.msk.f32.vlgmr.msra.gmra.mrb[4].mxu0 %vm32_vm1, %v4366_v30  ;;  %v1285_v21 = vand.u32 4294901760, %v1284_v41  ;;  %2530 = vmatprep.subr.bf16.mxu1 %v2529_v60 }
  0xe6   :  { %2488 = vmatpush3.bf16.msra.mxu0 %v3863_v31  ;;  %v2533_v17 = vpack.c.bf16 %v1271_v57, %v1264_v62  ;;  %v1291_v25 = vsub.f32 %v3851_v43, %v1290_v53  ;;  %v4454_v4 = vand.u32 4294901760, %v3856_v33  ;;  %v4456_v15 = vand.u32 4294901760, %v3523_v7  ;;  %1080 = vmatprep.mubr.f32.mxu0 %v1079_v2 }
  0xe7   :  { %2490 = vmatprep.subr.bf16.mxu0 %v3891_v58  ;;  %v4457_v60 = vand.u32 4294901760, %v3579_v55  ;;  %v4458_v20 = vand.u32 4294901760, %v3605_v18  ;;  %v1166_v41 = vand.u32 4294901760, %v1165_v28  ;;  %v1173_v62 = vand.u32 4294901760, %v1172_v19 }
  0xe8   :  { %v1298_v46 = vsub.f32 %v3856_v33, %v4454_v4  ;;  %v3921_v9 = vpack.c.bf16 %v4456_v15, %v4455_v50  ;;  %2532 = vmatpush3.bf16.msra.mxu1 %v2531_v45  ;;  %v2535_v57 = vpack.c.bf16 %v1159_v56, %v1152_v47  ;;  %v2537_v37 = vpack.c.bf16 %v1285_v21, %v1278_v22  ;;  %v3949_v21 = vpop.permute.xlu1 %42 }
  0xe9   :  { %v3927_v14 = vpack.c.bf16 %v4458_v20, %v4457_v60  ;;  %v4459_v29 = vand.u32 4294901760, %v3429_v34  ;;  %v4460_v7 = vand.u32 4294901760, %v3434_v44  ;;  %2534 = vmatprep.subr.bf16.mxu1 %v2533_v17  ;;  %v1292_v55 = vand.u32 4294901760, %v1291_v25 }
  0xea   :  { %2492 = vmatpush3.bf16.msra.mxu0 %v3897_v23  ;;  %v1299_v18 = vand.u32 4294901760, %v1298_v46  ;;  %v4461_v2 = vand.u32 4294901760, %v3448_v35  ;;  %v4462_v45 = vand.u32 4294901760, %v3453_v26  ;;  %v4463_v19 = vand.u32 4294901760, %v3620_v12 }
  0xeb   :  { %v1179_v59 = vsub.f32 %v3429_v34, %v4459_v29  ;;  %v1186_v51 = vsub.f32 %v3434_v44, %v4460_v7  ;;  %2494 = vmatprep.subr.bf16.mxu0 %v3921_v9  ;;  %v4464_v47 = vand.u32 4294901760, %v3622_v13  ;;  %v2539_v22 = vpack.c.bf16 %v1173_v62, %v1166_v41 }
  0xec   :  { %v1305_v36 = vsub.f32 %v3448_v35, %v4461_v2  ;;  %v1312_v28 = vsub.f32 %v3453_v26, %v4462_v45  ;;  %2536 = vmatpush3.bf16.msra.mxu1 %v2535_v57  ;;  %v4465_v4 = vand.u32 4294901760, %v3461_v3  ;;  %v4466_v50 = vand.u32 4294901760, %v3466_v63  ;;  %v4474_v2 = vld [vmem:[#allocation12_spill] sm:$0xff] }
  0xed   :  { %v3947_v56 = vpack.c.bf16 %v4464_v47, %v4463_v19  ;;  %v1180_v17 = vand.u32 4294901760, %v1179_v59  ;;  %v1187_v25 = vand.u32 4294901760, %v1186_v51  ;;  %2538 = vmatprep.subr.bf16.mxu1 %v2537_v37  ;;  %v4467_v12 = vand.u32 4294901760, %v3653_v6 }
  0xee   :  { %v1193_v46 = vsub.f32 %v3461_v3, %v4465_v4  ;;  %v1200_v15 = vsub.f32 %v3466_v63, %v4466_v50  ;;  %2496 = vmatpush3.bf16.msra.mxu0 %v3927_v14  ;;  %v4468_v13 = vand.u32 4294901760, %v3661_v42  ;;  %v2541_v20 = vpack.c.bf16 %v1299_v18, %v1292_v55 }
  0xef   :  { %v1306_v41 = vand.u32 4294901760, %v1305_v36  ;;  %v1313_v62 = vand.u32 4294901760, %v1312_v28  ;;  %2498 = vmatprep.subr.bf16.mxu0 %v3947_v56  ;;  %v4469_v57 = vand.u32 4294901760, %v3663_v61  ;;  %v4470_v29 = vand.u32 4294901760, %v3688_v38 }
  0xf0   :  { %v3962_v60 = vpack.c.bf16 %v4468_v13, %v4467_v12  ;;  %vm44_vm3 = vcmp.eq.s32.totalorder %v3949_v21, %v3337_v48  ;;  %2540 = vmatpush3.bf16.msra.mxu1 %v2539_v22  ;;  %v2543_v6 = vpack.c.bf16 %v1187_v25, %v1180_v17  ;;  %v1194_v37 = vand.u32 4294901760, %v1193_v46 }
  0xf1   :  { %v3969_v59 = vpack.c.bf16 %v4470_v29, %v4469_v57  ;;  %v1201_v42 = vand.u32 4294901760, %v1200_v15  ;;  %2542 = vmatprep.subr.bf16.mxu1 %v2541_v20  ;;  %v4471_v7 = vand.u32 4294901760, %v3698_v0  ;;  %v4472_v51 = vand.u32 4294901760, %v3710_v32  ;;  %v4490_v57 = vld [vmem:[#allocation19_spill] sm:$0xff] }
  0xf2   :  { %2500 = vmatpush3.bf16.msra.mxu0 %v3962_v60  ;;  %v2545_v61 = vpack.c.bf16 %v1313_v62, %v1306_v41  ;;  %v4473_v38 = vmov 0.0   ;;  %v4475_v36 = vand.u32 4294901760, %v4474_v2  ;;  %v4476_v45 = vand.u32 4294901760, %v3714_v54  ;;  %v4497_v2 = vld [vmem:[#allocation27_spill] sm:$0xff] }
  0xf3   :  { %v3978_v55 = vpack.c.bf16 %v4472_v51, %v4471_v7  ;;  %v1859_v18 = vsel %vm44_vm3, 1.0, %v4473_v38  ;;  %2502 = vmatprep.subr.bf16.mxu0 %v3969_v59  ;;  %v2547_v32 = vpack.c.bf16 %v1201_v42, %v1194_v37  ;;  %v4477_v19 = vand.u32 4294901760, %v3751_v24  ;;  %v4481_v24 = vld [vmem:[#allocation8_spill] sm:$0xff]  ;;  %v4495_v51 = vld [vmem:[#allocation25_spill] sm:$0xff] }
  0xf4   :  { %v3989_v28 = vpack.c.bf16 %v4476_v45, %v4475_v36  ;;  %2544 = vmatpush3.bf16.msra.mxu1 %v2543_v6  ;;  %v3991_v0 = vsub.f32 %v1859_v18, %v1859_v18  ;;  %v4478_v47 = vand.u32 4294901760, %v3753_v49  ;;  %v4479_v17 = vand.u32 4294901760, %v3776_v52  ;;  %v4483_v49 = vld [vmem:[#allocation9_spill] sm:$0xff]  ;;  %v4485_v52 = vld [vmem:[#allocation10_spill] sm:$0xff]  ;;  %v4492_v6 = vld [vmem:[#allocation20_spill] sm:$0xff] }
  0xf5   :  { %2546 = vmatprep.subr.bf16.mxu1 %v2545_v61  ;;  %v4480_v54 = vand.u32 4294901760, %v3778_v27  ;;  %v4482_v46 = vand.u32 4294901760, %v4481_v24  ;;  %v4484_v50 = vand.u32 4294901760, %v4483_v49  ;;  %v4486_v12 = vand.u32 4294901760, %v4485_v52  ;;  %v4487_v27 = vld [vmem:[#allocation11_spill] sm:$0xff]  ;;  %v4494_v7 = vld [vmem:[#allocation24_spill] sm:$0xff] }
  0xf6   :  { %2504 = vmatpush3.bf16.msra.mxu0 %v3978_v55  ;;  %v3998_v22 = vpack.c.bf16 %v4478_v47, %v4477_v19  ;;  %v1083_v4 = vand.u32 4294901760, %v3991_v0  ;;  %v4488_v13 = vand.u32 4294901760, %v4487_v27  ;;  %v4489_v41 = vand.u32 4294901760, %v3774_v8  ;;  %v4496_v18 = vld [vmem:[#allocation26_spill] sm:$0xff]  ;;  %v4498_v45 = vld [vmem:[#allocation28_spill] sm:$0xff]  ;;  %v4505_v52 = vld [vmem:[#allocation35_spill] sm:$0xff] }
  0xf7   :  { %2506 = vmatprep.subr.bf16.mxu0 %v3989_v28  ;;  %v4005_v25 = vpack.c.bf16 %v4480_v54, %v4479_v17  ;;  %v4014_v15 = vpack.c.bf16 %v4484_v50, %v4482_v46  ;;  %v4491_v29 = vand.u32 4294901760, %v4490_v57  ;;  %v4493_v37 = vand.u32 4294901760, %v4492_v6  ;;  %v4500_v47 = vld [vmem:[#allocation30_spill] sm:$0xff]  ;;  %v4501_v17 = vld [vmem:[#allocation31_spill] sm:$0xff]  ;;  %v4502_v24 = vld [vmem:[#allocation32_spill] sm:$0xff] }
  0xf8   :  { %2548 = vmatpush3.bf16.msra.mxu1 %v2547_v32  ;;  %v4021_v20 = vpack.c.bf16 %v4488_v13, %v4486_v12  ;;  %v1084_v62 = vsub.f32 %v3991_v0, %v1083_v4  ;;  %v2549_v61 = vpack.c.bf16 %v4495_v51, %v4494_v7  ;;  %v2551_v36 = vpack.c.bf16 %v4497_v2, %v4496_v18  ;;  %v4499_v32 = vld [vmem:[#allocation29_spill] sm:$0xff]  ;;  %v4504_v50 = vld [vmem:[#allocation34_spill] sm:$0xff] }
  0xf9   :  { %2582 = vmatprep.subr.bf16.mxu1 %v3730_v40  ;;  %v4037_v42 = vpack.c.bf16 %v4493_v37, %v4491_v29  ;;  %v2553_v19 = vpack.c.bf16 %v4499_v32, %v4498_v45  ;;  %v2555_v54 = vpack.c.bf16 %v4501_v17, %v4500_v47  ;;  %v4503_v46 = vld [vmem:[#allocation33_spill] sm:$0xff]  ;;  %v2559_v12 = vpack.c.bf16 %v4505_v52, %v4504_v50  ;;  %v4510_v29 = vld [vmem:[#allocation40_spill] sm:$0xff]  ;;  %v4511_v6 = vld [vmem:[#allocation14_spill] sm:$0xff] }
  0xfa   :  { %2508 = vmatpush3.bf16.msra.mxu0 %v3998_v22  ;;  %v1085_v38 = vand.u32 4294901760, %v1084_v62  ;;  %v2557_v49 = vpack.c.bf16 %v4503_v46, %v4502_v24  ;;  %v4506_v27 = vld [vmem:[#allocation37_spill] sm:$0xff]  ;;  %v4509_v62 = vld [vmem:[#allocation39_spill] sm:$0xff]  ;;  %v2565_v37 = vpack.c.bf16 %v4511_v6, %v4510_v29 }
  0xfb   :  { %2510 = vmatprep.subr.bf16.mxu0 %v4005_v25  ;;  %1868 = vmatmul.mubr.msk.f32.vlgmr.msra.gmra.mrb[6].mxu1 %vm44_vm3, %v4366_v30 }
  0xfc   :  { %2584 = vmatpush3.bf16.msra.mxu1 %v3863_v31  ;;  %1560 = vmatprep.mubr.f32.mxu1 %v4489_v41  ;;  %v4508_v41 = vld [vmem:[#allocation13_spill] sm:$0xff] }
  0xfd   :  { %2586 = vmatprep.subr.bf16.mxu1 %v3891_v58  ;;  %v2563_v57 = vpack.c.bf16 %v4509_v62, %v4508_v41 }
  0xfe   :  { %2512 = vmatpush3.bf16.msra.mxu0 %v4014_v15 }
  0xff   :  { %2514 = vmatprep.subr.bf16.mxu0 %v4021_v20 }
 0x100   :  { %2588 = vmatpush3.bf16.msra.mxu1 %v3897_v23 }
 0x101   :  { %2590 = vmatprep.subr.bf16.mxu1 %v3921_v9 }
 0x102   :  { %2516 = vmatpush3.bf16.msra.mxu0 %v4037_v42 }
 0x103   :  { %2550 = vmatprep.subr.bf16.mxu0 %v2549_v61  ;;  %v2567_v61 = vpack.c.bf16 %v3793_v11, %v3788_v10 }
 0x104   :  { %2592 = vmatpush3.bf16.msra.mxu1 %v3927_v14 }
 0x105   :  { %1086 = vmatmul.mubr.f32.vlgmr.msra.gmra.mrb[6].mxu0 %v1085_v38  ;;  %2594 = vmatprep.subr.bf16.mxu1 %v3947_v56  ;;  %v2569_v38 = vpack.c.bf16 %v3803_v5, %v3798_v16 }
 0x106   :  { %2552 = vmatpush3.bf16.msra.mxu0 %v2551_v36  ;;  %1453 = vmatprep.mubr.f32.mxu0 %v3774_v8  ;;  %v4507_v8 = vld [vmem:[#allocation38_spill] sm:$0xff]  ;;  %v2571_v36 = vpack.c.bf16 %v3832_v1, %v3827_v39 }
 0x107   :  { %2554 = vmatprep.subr.bf16.mxu0 %v2553_v19  ;;  %v2561_v13 = vpack.c.bf16 %v4507_v8, %v4506_v27  ;;  %v2573_v19 = vpack.c.bf16 %v3856_v33, %v3851_v43 }
 0x108   :  { %2596 = vmatpush3.bf16.msra.mxu1 %v3962_v60 }
 0x109   :  { %2598 = vmatprep.subr.bf16.mxu1 %v3969_v59 }
 0x10a   :  { %2556 = vmatpush3.bf16.msra.mxu0 %v2555_v54  ;;  %v2575_v54 = vpack.c.bf16 %v3434_v44, %v3429_v34  ;;  %v4513_v34 = vand.u32 4294901760, %v4494_v7  ;;  %v4514_v44 = vand.u32 4294901760, %v4495_v51  ;;  %v4521_v51 = vand.u32 4294901760, %v4502_v24 }
 0x10b   :  { %2558 = vmatprep.subr.bf16.mxu0 %v2557_v49  ;;  %v2577_v49 = vpack.c.bf16 %v3453_v26, %v3448_v35  ;;  %v4515_v26 = vand.u32 4294901760, %v4496_v18  ;;  %v4529_v24 = vand.u32 4294901760, %v4510_v29 }
 0x10c   :  { %2600 = vmatpush3.bf16.msra.mxu1 %v3978_v55  ;;  %v2613_v35 = vpack.c.bf16 %v4514_v44, %v4513_v34 }
 0x10d   :  { %2602 = vmatprep.subr.bf16.mxu1 %v3989_v28 }
 0x10e   :  { %2560 = vmatpush3.bf16.msra.mxu0 %v2559_v12 }
 0x10f   :  { %2562 = vmatprep.subr.bf16.mxu0 %v2561_v13 }
 0x110   :  { %2604 = vmatpush3.bf16.msra.mxu1 %v3998_v22 }
 0x111   :  { %2606 = vmatprep.subr.bf16.mxu1 %v4005_v25 }
 0x112   :  { %2564 = vmatpush3.bf16.msra.mxu0 %v2563_v57 }
 0x113   :  { %2566 = vmatprep.subr.bf16.mxu0 %v2565_v37 }
 0x114   :  { %2608 = vmatpush3.bf16.msra.mxu1 %v4014_v15 }
 0x115   :  { %2610 = vmatprep.subr.bf16.mxu1 %v4021_v20 }
 0x116   :  { %2568 = vmatpush3.bf16.msra.mxu0 %v2567_v61 }
 0x117   :  { %2570 = vmatprep.subr.bf16.mxu0 %v2569_v38 }
 0x118   :  { %2612 = vmatpush3.bf16.msra.mxu1 %v4037_v42 }
 0x119   :  { %2646 = vmatprep.subr.bf16.mxu1 %v3730_v40  ;;  %v2579_v40 = vpack.c.bf16 %v3466_v63, %v3461_v3  ;;  %v4518_v3 = vand.u32 4294901760, %v4499_v32  ;;  %v4525_v32 = vand.u32 4294901760, %v4506_v27  ;;  %v4533_v27 = vand.u32 4294901760, %v3798_v16  ;;  %v4538_v16 = vld [vmem:[#allocation21_spill] sm:$0xff] }
 0x11a   :  { %2572 = vmatpush3.bf16.msra.mxu0 %v2571_v36 }
 0x11b   :  { %2574 = vmatprep.subr.bf16.mxu0 %v2573_v19  ;;  %1564 = vmatmul.mubr.f32.vlgmr.msra.gmra.mrb[8].mxu1 %v1083_v4 }
 0x11c   :  { %2648 = vmatpush3.bf16.msra.mxu1 %v3863_v31  ;;  %1871 = vmatprep.mubr.msk.f32.mxu1 %vm50_vm2, %v4366_v30  ;;  %v4516_v31 = vand.u32 4294901760, %v4497_v2  ;;  %v4524_v2 = vand.u32 4294901760, %v4505_v52 }
 0x11d   :  { %2650 = vmatprep.subr.bf16.mxu1 %v3891_v58  ;;  %v4517_v58 = vand.u32 4294901760, %v4498_v45 }
 0x11e   :  { %2576 = vmatpush3.bf16.msra.mxu0 %v2575_v54  ;;  %v2615_v4 = vpack.c.bf16 %v4516_v31, %v4515_v26 }
 0x11f   :  { %2578 = vmatprep.subr.bf16.mxu0 %v2577_v49  ;;  %v2617_v63 = vpack.c.bf16 %v4518_v3, %v4517_v58 }
 0x120   :  { %2652 = vmatpush3.bf16.msra.mxu1 %v3897_v23  ;;  %v4519_v23 = vand.u32 4294901760, %v4500_v47 }
 0x121   :  { %2654 = vmatprep.subr.bf16.mxu1 %v3921_v9  ;;  %v4520_v9 = vand.u32 4294901760, %v4501_v17 }
 0x122   :  { %2580 = vmatpush3.bf16.msra.mxu0 %v2579_v40 }
 0x123   :  { %2614 = vmatprep.subr.bf16.mxu0 %v2613_v35  ;;  %v2619_v7 = vpack.c.bf16 %v4520_v9, %v4519_v23 }
 0x124   :  { %2656 = vmatpush3.bf16.msra.mxu1 %v3927_v14  ;;  %v4523_v14 = vand.u32 4294901760, %v4504_v50 }
 0x125   :  { %1456 = vmatmul.mubr.f32.vlgmr.msra.gmra.mrb[8].mxu0 %v3991_v0  ;;  %2658 = vmatprep.subr.bf16.mxu1 %v3947_v56  ;;  %v4522_v0 = vand.u32 4294901760, %v4503_v46  ;;  %v4526_v56 = vand.u32 4294901760, %v4507_v8  ;;  %v4530_v46 = vand.u32 4294901760, %v4511_v6  ;;  %v4534_v8 = vand.u32 4294901760, %v3803_v5  ;;  %v4539_v5 = vld [vmem:[#allocation22_spill] sm:$0xff] }
 0x126   :  { %2616 = vmatpush3.bf16.msra.mxu0 %v2615_v4  ;;  %1869 = vmatprep.mubr.msk.f32.mxu0 %vm50_vm2, %v4366_v30  ;;  %v2623_v45 = vpack.c.bf16 %v4524_v2, %v4523_v14 }
 0x127   :  { %2618 = vmatprep.subr.bf16.mxu0 %v2617_v63  ;;  %v2621_v18 = vpack.c.bf16 %v4522_v0, %v4521_v51  ;;  %v2625_v47 = vpack.c.bf16 %v4526_v56, %v4525_v32  ;;  %v2629_v50 = vpack.c.bf16 %v4530_v46, %v4529_v24  ;;  %v2633_v13 = vpack.c.bf16 %v4534_v8, %v4533_v27 }
 0x128   :  { %2660 = vmatpush3.bf16.msra.mxu1 %v3962_v60  ;;  %v4527_v60 = vand.u32 4294901760, %v4508_v41 }
 0x129   :  { %2662 = vmatprep.subr.bf16.mxu1 %v3969_v59  ;;  %v4528_v59 = vand.u32 4294901760, %v4509_v62 }
 0x12a   :  { %2620 = vmatpush3.bf16.msra.mxu0 %v2619_v7 }
 0x12b   :  { %2622 = vmatprep.subr.bf16.mxu0 %v2621_v18  ;;  %v2627_v17 = vpack.c.bf16 %v4528_v59, %v4527_v60 }
 0x12c   :  { %2664 = vmatpush3.bf16.msra.mxu1 %v3978_v55  ;;  %v4531_v55 = vand.u32 4294901760, %v3788_v10 }
 0x12d   :  { %2666 = vmatprep.subr.bf16.mxu1 %v3989_v28  ;;  %v4532_v28 = vand.u32 4294901760, %v3793_v11  ;;  %v4537_v11 = vand.u32 4294901760, %v3856_v33 }
 0x12e   :  { %2624 = vmatpush3.bf16.msra.mxu0 %v2623_v45 }
 0x12f   :  { %2626 = vmatprep.subr.bf16.mxu0 %v2625_v47  ;;  %v2631_v52 = vpack.c.bf16 %v4532_v28, %v4531_v55  ;;  %v2637_v10 = vpack.c.bf16 %v4537_v11, %v1290_v53 }
 0x130   :  { %2668 = vmatpush3.bf16.msra.mxu1 %v3998_v22  ;;  %v4535_v22 = vand.u32 4294901760, %v3827_v39 }
 0x131   :  { %2670 = vmatprep.subr.bf16.mxu1 %v4005_v25  ;;  %v4536_v25 = vand.u32 4294901760, %v3832_v1  ;;  %v4540_v1 = vld [vmem:[#allocation23_spill] sm:$0xff] }
 0x132   :  { %2628 = vmatpush3.bf16.msra.mxu0 %v2627_v17 }
 0x133   :  { %2630 = vmatprep.subr.bf16.mxu0 %v2629_v50  ;;  %v2635_v41 = vpack.c.bf16 %v4536_v25, %v4535_v22 }
 0x134   :  { %2672 = vmatpush3.bf16.msra.mxu1 %v4014_v15 }
 0x135   :  { %2674 = vmatprep.subr.bf16.mxu1 %v4021_v20 }
 0x136   :  { %2632 = vmatpush3.bf16.msra.mxu0 %v2631_v52 }
 0x137   :  { %2634 = vmatprep.subr.bf16.mxu0 %v2633_v13 }
 0x138   :  { %2676 = vmatpush3.bf16.msra.mxu1 %v4037_v42 }
 0x13a   :  { %2636 = vmatpush3.bf16.msra.mxu0 %v2635_v41 }
 0x13b   :  { %2638 = vmatprep.subr.bf16.mxu0 %v2637_v10  ;;  %1872 = vmatmul.mubr.msk.f32.vlgmr.msra.gmra.mrb[10].mxu1 %vm44_vm3, %v4366_v30 }
 0x13e   :  { %2640 = vmatpush3.bf16.msra.mxu0 %v4538_v16 }
 0x13f   :  { %2642 = vmatprep.subr.bf16.mxu0 %v4539_v5 }
 0x142   :  { %2644 = vmatpush3.bf16.msra.mxu0 %v4540_v1 }
 0x145   :  { %1870 = vmatmul.mubr.msk.f32.vlgmr.msra.gmra.mrb[10].mxu0 %vm44_vm3, %v4366_v30 }
 0x16e   :  { %v1940_v33 = vpop.f32.mrb[0].mxu1 }
 0x16f   :  { %v1941_v39 = vpop.f32.mrb[1].mxu1 }
 0x170   :  { %v1942_v43 = vadd.f32 %v1941_v39, %v1940_v33 }
 0x177   :  { %v1905_v53 = vpop.f32.mrb[0].mxu0 }
 0x178   :  { %v1906_v15 = vpop.f32.mrb[1].mxu0 }
 0x179   :  { %v1907_v20 = vadd.f32 %v1906_v15, %v1905_v53 }
 0x17b   :  { %v458_v42 = vadd.f32 %v1942_v43, %v1907_v20 }
 0x18e   :  { %v2010_v62 = vpop.f32.mrb[2].mxu1 }
 0x18f   :  { %v2011_v57 = vpop.f32.mrb[3].mxu1 }
 0x190   :  { %v2012_v29 = vadd.f32 %v2011_v57, %v2010_v62 }
 0x198   :  { %v1975_v6 = vpop.f32.mrb[2].mxu0 }
 0x199   :  { %v1976_v37 = vpop.f32.mrb[3].mxu0 }
 0x19a   :  { %v1977_v61 = vadd.f32 %v1976_v37, %v1975_v6 }
 0x19c   :  { %v596_v38 = vadd.f32 %v1977_v61, %v458_v42 }
 0x19e   :  { %v704_v36 = vadd.f32 %v2012_v29, %v596_v38 }
 0x1ae   :  { %v2080_v19 = vpop.f32.mrb[4].mxu1 }
 0x1af   :  { %v2081_v54 = vpop.f32.mrb[5].mxu1 }
 0x1b0   :  { %v2082_v49 = vadd.f32 %v2081_v54, %v2080_v19 }
 0x1b8   :  { %v2045_v48 = vpop.f32.mrb[4].mxu0 }
 0x1b9   :  { %v2046_v30 = vpop.f32.mrb[5].mxu0 }
 0x1ba   :  { %v2047_v21 = vadd.f32 %v2046_v30, %v2045_v48 }
 0x1bc   :  { %v872_v12 = vadd.f32 %v2047_v21, %v704_v36 }
 0x1be   :  { %v976_v40 = vadd.f32 %v2082_v49, %v872_v12 }
 0x1ce   :  { %v2150_v34 = vpop.f32.mrb[6].mxu1 }
 0x1cf   :  { %v2151_v44 = vpop.f32.mrb[7].mxu1 }
 0x1d0   :  { %v2152_v35 = vadd.f32 %v2151_v44, %v2150_v34 }
 0x1d8   :  { %v2115_v26 = vpop.f32.mrb[6].mxu0 }
 0x1d9   :  { %v2116_v31 = vpop.f32.mrb[7].mxu0 }
 0x1da   :  { %v2117_v4 = vadd.f32 %v2116_v31, %v2115_v26 }
 0x1dc   :  { %v1088_v58 = vadd.f32 %v2117_v4, %v976_v40 }
 0x1de   :  { %v1320_v3 = vadd.f32 %v2152_v35, %v1088_v58 }
 0x1ee   :  { %v2220_v63 = vpop.f32.mrb[8].mxu1 }
 0x1ef   :  { %v2221_v23 = vpop.f32.mrb[9].mxu1 }
 0x1f0   :  { %v2222_v9 = vadd.f32 %v2221_v23, %v2220_v63 }
 0x1f8   :  { %v2185_v7 = vpop.f32.mrb[8].mxu0 }
 0x1f9   :  { %v2186_v51 = vpop.f32.mrb[9].mxu0 }
 0x1fa   :  { %v2187_v0 = vadd.f32 %v2186_v51, %v2185_v7 }
 0x1fc   :  { %v1458_v18 = vadd.f32 %v2187_v0, %v1320_v3 }
 0x1fe   :  { %v1566_v14 = vadd.f32 %v2222_v9, %v1458_v18 }
 0x20e   :  { %v2290_v2 = vpop.f32.mrb[10].mxu1 }
 0x20f   :  { %v2291_v45 = vpop.f32.mrb[11].mxu1 }
 0x210   :  { %v2292_v32 = vadd.f32 %v2291_v45, %v2290_v2 }
 0x218   :  { %v2255_v56 = vpop.f32.mrb[10].mxu0 }
 0x219   :  { %v2256_v47 = vpop.f32.mrb[11].mxu0 }
 0x21a   :  { %v2257_v60 = vadd.f32 %v2256_v47, %v2255_v56 }
 0x21c   :  { %v1734_v59 = vadd.f32 %v2257_v60, %v1566_v14 }
 0x21e   :  { %v1838_v17 = vadd.f32 %v2292_v32, %v1734_v59 }
 0x220   :  { %1841 = vst [vmem:[#allocation5] sm:$0xff] %v1838_v17 }
 0x221   :  { %2725 = shalt.err (!%p2722_p12)
}
 0x222   :  { %s2726_s28 = scalar_lea.hbm %s4189_s2, 128 }
 0x223   :  { %p2727_p13 = scmp.ne.s32.totalorder %s4189_s2, %s2726_s28  ;;  %p2730_p0 = scmp.lt.u32.totalorder %s2726_s28, %s4189_s2 }
 0x225   :  { %p2732_p1 = pnand %p2730_p0, %p2727_p13 }
 0x227   :  { %2735 = shalt.err (!%p2732_p1)
}
 0x228   :  { %1851 = dma.vmem_to_hbm [thread:$0]  %s1849_s1, 128, %s4189_s2, [#allocation4]  }
 0x229   :  { %2738 = dma.done.wait [#allocation4], 128  }
 0x22a   :  { %2739 = vsyncadd [#allocation4], 4294967168 }
 0x22b   :  { %1855 = vsyncpa [#allocation3], 1 }
 0x22c   :  { %1856 = vsyncpa [#allocation4], 1 }

</bundles_post_ra>
